<compile_context>
chip_gen: v6e
topology: v6e:2x2x1
jax: 0.10.0
libtpu: 0.0.40
codegen_flags: <defaults>
</compile_context>

<pallas_src>
import functools
import math

import jax
import jax.numpy as jnp
from jax.experimental import pallas as pl
from jax.experimental.pallas import tpu as pltpu


_EPS = 1e-6  # the module constructs nn.LayerNorm(..., eps=1e-06)


def _layernorm_rows(x, gamma, beta):
    # LayerNorm over the last axis (features on lanes).  Used only for Q.
    mu = jnp.mean(x, axis=-1, keepdims=True)
    var = jnp.mean((x - mu) ** 2, axis=-1, keepdims=True)
    return (x - mu) * jax.lax.rsqrt(var + _EPS) * gamma + beta


def _layernorm_cols(x, gamma_col, beta_col):
    # LayerNorm over axis 0 (features on sublanes, entities on lanes).
    mu = jnp.mean(x, axis=0, keepdims=True)
    var = jnp.mean((x - mu) ** 2, axis=0, keepdims=True)
    return (x - mu) * jax.lax.rsqrt(var + _EPS) * gamma_col + beta_col


def _relational_attention_kernel(
    e_row_ref,      # (TQ, d_model)            query-side entity rows (this tile)
    eT_ref,         # (d_model, N)             transposed entities (K/V source)
    eT_res_ref,     # (d_model, TQ)            residual tile (same array, tiled)
    wq_ref,         # (d_model, dkh)
    wkvT_ref,       # (dkh + dvh, d_model)     stacked [Wk^T ; Wv^T]
    woT3_ref,       # (n_heads, d_model, d_v)  per-head W_o^T
    head_mask_ref,  # (n_heads, dkh, 1)        1.0 on this head's K features
    g_emb_row_ref,  # (1, dkh)
    b_emb_row_ref,  # (1, dkh)
    g_emb_col_ref,  # (dkh, 1)
    b_emb_col_ref,  # (dkh, 1)
    g_out_col_ref,  # (d_model, 1)
    b_out_col_ref,  # (d_model, 1)
    o_ref,          # (d_model, TQ)            lane-dense output tile
    *,
    n_heads: int,
    d_kq: int,
    d_v: int,
):
    f32 = jnp.float32
    dkh = n_heads * d_kq
    d_model, tq = o_ref.shape
    inv_norm = 1.0 / math.sqrt(d_kq)

    # --- K / V projections in transposed layout (features x N, N on lanes) ---
    eT = eT_ref[...]                                                   # (D, N)
    kvT = jnp.dot(wkvT_ref[...], eT, preferred_element_type=f32)       # (dkh+dvh, N)
    g_c = g_emb_col_ref[...]
    b_c = b_emb_col_ref[...]
    kT = _layernorm_cols(kvT[:dkh, :], g_c, b_c)                       # (dkh, N)
    vT = _layernorm_cols(kvT[dkh:, :], g_c, b_c)                       # (dvh, N)

    # --- Q projection for this query tile, row layout (TQ, dkh) ---
    q = jnp.dot(e_row_ref[...], wq_ref[...], preferred_element_type=f32)
    q = _layernorm_rows(q, g_emb_row_ref[...], b_emb_row_ref[...])

    # --- per-head attention, accumulated straight into W_o output ---
    # TODO(synk): for large N adopt flash-style KV tiling (online softmax);
    # at N=256 the full key axis fits comfortably per query tile.
    new_vT = jnp.zeros((d_model, tq), f32)
    for h in range(n_heads):                       # small & static: unrolled
        # Head-masked K keeps Q full-width (no lane slicing / no transposes).
        khT = kT * head_mask_ref[h]                                    # (dkh, N)
        s = jnp.dot(q, khT, preferred_element_type=f32) * inv_norm     # (TQ, N)
        s = s - jnp.max(s, axis=-1, keepdims=True)
        p = jnp.exp(s)
        p = p * pl.reciprocal(jnp.sum(p, axis=-1, keepdims=True), approx=True)
        # TODO(synk): attention dropout (drop_prob=0.0 in this module) omitted.
        vhT = vT[h * d_v:(h + 1) * d_v, :]                             # (d_v, N)
        # o_h^T = V_h^T contracted with P over the key axis (last dim of both).
        ohT = jax.lax.dot_general(
            vhT, p, (((1,), (1,)), ((), ())), preferred_element_type=f32
        )                                                              # (d_v, TQ)
        new_vT = new_vT + jnp.dot(woT3_ref[h], ohT,
                                  preferred_element_type=f32)          # (D, TQ)

    out = _layernorm_cols(new_vT + eT_res_ref[...],
                          g_out_col_ref[...], b_out_col_ref[...])
    o_ref[...] = jnp.maximum(out, 0.0)                                 # ReLU


def relational_attention(
    x,            # (B, C, H, W) float32, NCHW like the PyTorch module
    params,       # dict of weights (see init_params)
    *,
    d_kq: int,
    d_v: int,
    n_heads: int,
    maxout: bool = False,
):
    b_sz, n_channel, height, width = x.shape
    d_model = n_channel + 2
    n = height * width
    dkh = d_kq * n_heads
    dvh = d_v * n_heads
    # Module quirk: layer_norm_embed (width dkh) is also applied to V (width dvh).
    assert dkh == dvh, "layer_norm_embed width must match d_v * n_heads"

    # --- plain-JAX glue: entity embeddings in both layouts (tiny arrays) ---
    idx = jnp.arange(n)
    coord_t = jnp.stack(
        [(idx // width).astype(jnp.float32) / height,
         (idx % width).astype(jnp.float32) / width],
        axis=0,
    )                                                                  # (2, N)
    e_t = jnp.concatenate(
        [x.reshape(b_sz, n_channel, n).astype(jnp.float32),
         jnp.broadcast_to(coord_t[None], (b_sz, 2, n))],
        axis=1,
    )                                                                  # (B, D, N)
    e_row = jnp.transpose(e_t, (0, 2, 1))                              # (B, N, D)

    # --- pack / transpose weights (XLA side, negligible) ---
    wkv_t = jnp.concatenate([params["wk"].T, params["wv"].T], axis=0)  # (dkh+dvh, D)
    wo_t3 = jnp.transpose(params["wo"].reshape(n_heads, d_v, d_model),
                          (0, 2, 1))                                   # (H, D, d_v)
    head_mask = (jnp.arange(dkh)[None, :, None] // d_kq
                 == jnp.arange(n_heads)[:, None, None]
                 ).astype(jnp.float32)                                 # (H, dkh, 1)
    g_emb_row = params["ln_embed_gamma"].reshape(1, dkh)
    b_emb_row = params["ln_embed_beta"].reshape(1, dkh)
    g_emb_col = params["ln_embed_gamma"].reshape(dkh, 1)
    b_emb_col = params["ln_embed_beta"].reshape(dkh, 1)
    g_out_col = params["ln_out_gamma"].reshape(d_model, 1)
    b_out_col = params["ln_out_beta"].reshape(d_model, 1)

    # query-tile size: biggest of {128,64,32,16,8} that divides N (else N).
    tq = n
    for cand in (128, 64, 32, 16, 8):
        if n % cand == 0:
            tq = cand
            break
    n_tiles = n // tq

    kernel = functools.partial(
        _relational_attention_kernel, n_heads=n_heads, d_kq=d_kq, d_v=d_v
    )

    flops_per_batch = (
        n_tiles * 2 * (dkh + dvh) * d_model * n          # fused K/V projection
        + 2 * n * d_model * dkh                          # Q projection
        + n_heads * (2 * n * n * dkh + 2 * n * n * d_v)  # scores + P@V
        + n_heads * 2 * n * d_v * d_model                # output projection
    )
    cost = pl.CostEstimate(
        flops=int(b_sz * flops_per_batch),
        transcendentals=int(b_sz * n_heads * n * n),
        bytes_accessed=int(4 * (3 * b_sz * n * d_model          # e_t, e_row, out
                                + d_model * (dkh + dkh + dvh)   # weights
                                + dvh * d_model)),
    )

    out_t = pl.pallas_call(
        kernel,
        out_shape=jax.ShapeDtypeStruct((b_sz, d_model, n), jnp.float32),
        grid_spec=pltpu.PrefetchScalarGridSpec(
            num_scalar_prefetch=0,
            grid=(b_sz, n_tiles),
            in_specs=[
                pl.BlockSpec((None, tq, d_model), lambda b, t: (b, t, 0)),   # e_row tile
                pl.BlockSpec((None, d_model, n), lambda b, t: (b, 0, 0)),    # e_t full
                pl.BlockSpec((None, d_model, tq), lambda b, t: (b, 0, t)),   # e_t residual tile
                pl.BlockSpec((d_model, dkh), lambda b, t: (0, 0)),           # wq
                pl.BlockSpec((dkh + dvh, d_model), lambda b, t: (0, 0)),     # [wk;wv]^T
                pl.BlockSpec((n_heads, d_model, d_v), lambda b, t: (0, 0, 0)),  # wo^T per head
                pl.BlockSpec((n_heads, dkh, 1), lambda b, t: (0, 0, 0)),     # head masks
                pl.BlockSpec((1, dkh), lambda b, t: (0, 0)),
                pl.BlockSpec((1, dkh), lambda b, t: (0, 0)),
                pl.BlockSpec((dkh, 1), lambda b, t: (0, 0)),
                pl.BlockSpec((dkh, 1), lambda b, t: (0, 0)),
                pl.BlockSpec((d_model, 1), lambda b, t: (0, 0)),
                pl.BlockSpec((d_model, 1), lambda b, t: (0, 0)),
            ],
            out_specs=pl.BlockSpec((None, d_model, tq), lambda b, t: (b, 0, t)),
        ),
        compiler_params=pltpu.CompilerParams(
            dimension_semantics=("parallel", "parallel"),
        ),
        cost_estimate=cost,
    )(
        e_row, e_t, e_t,
        params["wq"], wkv_t, wo_t3, head_mask,
        g_emb_row, b_emb_row, g_emb_col, b_emb_col, g_out_col, b_out_col,
    )

    if maxout:
        return jnp.max(out_t, axis=2)             # (B, d_model) == max over entities
    return jnp.transpose(out_t, (0, 2, 1))        # (B, N, d_model)


def init_params(key, d_model, d_kq, d_v, n_heads):
    """Deterministic synthetic parameter init (shapes match the nn.Module)."""
    dkh = d_kq * n_heads
    dvh = d_v * n_heads
    k1, k2, k3, k4 = jax.random.split(key, 4)
    scale = 0.1
    return {
        # stored as (in, out) so the math is x @ W
        "wq": scale * jax.random.normal(k1, (d_model, dkh), jnp.float32),
        "wk": scale * jax.random.normal(k2, (d_model, dkh), jnp.float32),
        "wv": scale * jax.random.normal(k3, (d_model, dvh), jnp.float32),
        "wo": scale * jax.random.normal(k4, (dvh, d_model), jnp.float32),
        # LayerNorm affine params (PyTorch defaults: ones / zeros)
        "ln_embed_gamma": jnp.ones((dkh,), jnp.float32),
        "ln_embed_beta": jnp.zeros((dkh,), jnp.float32),
        "ln_out_gamma": jnp.ones((d_model,), jnp.float32),
        "ln_out_beta": jnp.zeros((d_model,), jnp.float32),
    }


def _reference(x, params, *, d_kq, d_v, n_heads, maxout=False):
    """Pure-JAX reference mirroring the PyTorch forward, for verification."""
    b_sz, c, h, w = x.shape
    d_model = c + 2
    n = h * w
    entity = jnp.transpose(x.reshape(b_sz, c, n), (0, 2, 1))
    idx = jnp.arange(n)
    coord = jnp.stack(
        [(idx // w).astype(jnp.float32) / h, (idx % w).astype(jnp.float32) / w], -1
    )
    e = jnp.concatenate([entity, jnp.broadcast_to(coord[None], (b_sz, n, 2))], -1)

    def ln(v, g, bta):
        mu = v.mean(-1, keepdims=True)
        var = ((v - mu) ** 2).mean(-1, keepdims=True)
        return (v - mu) / jnp.sqrt(var + 1e-6) * g + bta

    q = ln(e @ params["wq"], params["ln_embed_gamma"], params["ln_embed_beta"])
    k = ln(e @ params["wk"], params["ln_embed_gamma"], params["ln_embed_beta"])
    v = ln(e @ params["wv"], params["ln_embed_gamma"], params["ln_embed_beta"])
    q = q.reshape(b_sz, n, n_heads, d_kq).transpose(0, 2, 1, 3)
    k = k.reshape(b_sz, n, n_heads, d_kq).transpose(0, 2, 1, 3)
    v = v.reshape(b_sz, n, n_heads, d_v).transpose(0, 2, 1, 3)
    s = jnp.einsum("bhqd,bhkd->bhqk", q, k) / math.sqrt(d_kq)
    p = jax.nn.softmax(s, axis=-1)
    nv = jnp.einsum("bhqk,bhkd->bhqd", p, v).transpose(0, 2, 1, 3).reshape(b_sz, n, -1)
    nv = nv @ params["wo"]
    out = ln(nv + e, params["ln_out_gamma"], params["ln_out_beta"])
    out = jnp.maximum(out, 0.0)
    if maxout:
        out = out.max(axis=1)
    return out


if __name__ == "__main__":
    # Small shapes consistent with the module: x is NCHW.
    B, C, H, W = 2, 4, 16, 16
    d_model = C + 2           # module appends 2 coordinate channels
    d_kq, d_v, n_heads = 8, 8, 2

    key = jax.random.PRNGKey(0)
    kx, kp = jax.random.split(key)
    x = jax.random.normal(kx, (B, C, H, W), jnp.float32)
    params = init_params(kp, d_model, d_kq, d_v, n_heads)

    out = relational_attention(x, params, d_kq=d_kq, d_v=d_v, n_heads=n_heads)
    out = jax.block_until_ready(out)

    ref = _reference(x, params, d_kq=d_kq, d_v=d_v, n_heads=n_heads)
    assert out.shape == (B, H * W, d_model), out.shape
    assert jnp.allclose(out, ref, rtol=2e-3, atol=2e-3), float(
        jnp.max(jnp.abs(out - ref))
    )
    print("KERNEL_OK")
</pallas_src>

<mosaic_0001>
module attributes {stable_mosaic.version = 11 : i64} {
  func.func @_relational_attention_kernel(%arg0: i32, %arg1: i32, %arg2: memref<1x128x6xf32, #tpu.memory_space<vmem>>, %arg3: memref<1x6x256xf32, #tpu.memory_space<vmem>>, %arg4: memref<1x6x128xf32, #tpu.memory_space<vmem>>, %arg5: memref<6x16xf32, #tpu.memory_space<vmem>>, %arg6: memref<32x6xf32, #tpu.memory_space<vmem>>, %arg7: memref<2x6x8xf32, #tpu.memory_space<vmem>>, %arg8: memref<2x16x1xf32, #tpu.memory_space<vmem>>, %arg9: memref<1x16xf32, #tpu.memory_space<vmem>>, %arg10: memref<1x16xf32, #tpu.memory_space<vmem>>, %arg11: memref<16x1xf32, #tpu.memory_space<vmem>>, %arg12: memref<16x1xf32, #tpu.memory_space<vmem>>, %arg13: memref<6x1xf32, #tpu.memory_space<vmem>>, %arg14: memref<6x1xf32, #tpu.memory_space<vmem>>, %arg15: memref<1x6x128xf32, #tpu.memory_space<vmem>>) attributes {dimension_semantics = [#tpu.dimension_semantics<parallel>, #tpu.dimension_semantics<parallel>], iteration_bounds = array<i64: 2, 2>, scalar_prefetch = 0 : i64, scratch_operands = 0 : i64, tpu.core_type = #tpu.core_type<tc>, window_params = [{transform_indices = @transform_0, window_bounds = array<i64: 1, 128, 6>}, {transform_indices = @transform_1, window_bounds = array<i64: 1, 6, 256>}, {transform_indices = @transform_2, window_bounds = array<i64: 1, 6, 128>}, {pipeline_mode = #tpu.pipeline_mode<synchronous>, transform_indices = @transform_3, window_bounds = array<i64: 6, 16>}, {pipeline_mode = #tpu.pipeline_mode<synchronous>, transform_indices = @transform_4, window_bounds = array<i64: 32, 6>}, {pipeline_mode = #tpu.pipeline_mode<synchronous>, transform_indices = @transform_5, window_bounds = array<i64: 2, 6, 8>}, {pipeline_mode = #tpu.pipeline_mode<synchronous>, transform_indices = @transform_6, window_bounds = array<i64: 2, 16, 1>}, {pipeline_mode = #tpu.pipeline_mode<synchronous>, transform_indices = @transform_7, window_bounds = array<i64: 1, 16>}, {pipeline_mode = #tpu.pipeline_mode<synchronous>, transform_indices = @transform_8, window_bounds = array<i64: 1, 16>}, {pipeline_mode = #tpu.pipeline_mode<synchronous>, transform_indices = @transform_9, window_bounds = array<i64: 16, 1>}, {pipeline_mode = #tpu.pipeline_mode<synchronous>, transform_indices = @transform_10, window_bounds = array<i64: 16, 1>}, {pipeline_mode = #tpu.pipeline_mode<synchronous>, transform_indices = @transform_11, window_bounds = array<i64: 6, 1>}, {pipeline_mode = #tpu.pipeline_mode<synchronous>, transform_indices = @transform_12, window_bounds = array<i64: 6, 1>}, {transform_indices = @transform_13, window_bounds = array<i64: 1, 6, 128>}]} {
    %c0 = arith.constant 0 : index
    %c0_0 = arith.constant 0 : index
    %c0_1 = arith.constant 0 : index
    %0 = vector.load %arg3[%c0, %c0_0, %c0_1] : memref<1x6x256xf32, #tpu.memory_space<vmem>>, vector<1x6x256xf32>
    %1 = vector.shape_cast %0 : vector<1x6x256xf32> to vector<6x256xf32>
    %c0_2 = arith.constant 0 : index
    %c0_3 = arith.constant 0 : index
    %2 = vector.load %arg6[%c0_2, %c0_3] : memref<32x6xf32, #tpu.memory_space<vmem>>, vector<32x6xf32>
    %cst = arith.constant dense<0.000000e+00> : vector<32x256xf32>
    %3 = tpu.matmul %2, %1, %cst {dimension_numbers = #tpu.dot_dimension_numbers<[1], [0], [0], [1], [0, 0, 1, 1], [], []>} : vector<32x6xf32>, vector<6x256xf32>, vector<32x256xf32> -> vector<32x256xf32>
    %c0_4 = arith.constant 0 : index
    %c0_5 = arith.constant 0 : index
    %4 = vector.load %arg11[%c0_4, %c0_5] : memref<16x1xf32, #tpu.memory_space<vmem>>, vector<16x1xf32>
    %c0_6 = arith.constant 0 : index
    %c0_7 = arith.constant 0 : index
    %5 = vector.load %arg12[%c0_6, %c0_7] : memref<16x1xf32, #tpu.memory_space<vmem>>, vector<16x1xf32>
    %6 = vector.extract_strided_slice %3 {offsets = [0, 0], sizes = [16, 256], strides = [1, 1]} : vector<32x256xf32> to vector<16x256xf32>
    %cst_8 = arith.constant dense<0.000000e+00> : vector<256xf32>
    %7 = vector.multi_reduction <add>, %6, %cst_8 [0] : vector<16x256xf32> to vector<256xf32>
    %8 = vector.shape_cast %7 : vector<256xf32> to vector<1x256xf32>
    %cst_9 = arith.constant 1.600000e+01 : f32
    %9 = vector.broadcast %cst_9 : f32 to vector<1x256xf32>
    %10 = arith.divf %8, %9 : vector<1x256xf32>
    %11 = vector.broadcast %10 : vector<1x256xf32> to vector<16x256xf32>
    %12 = arith.subf %6, %11 : vector<16x256xf32>
    %13 = arith.mulf %12, %12 : vector<16x256xf32>
    %cst_10 = arith.constant dense<0.000000e+00> : vector<256xf32>
    %14 = vector.multi_reduction <add>, %13, %cst_10 [0] : vector<16x256xf32> to vector<256xf32>
    %15 = vector.shape_cast %14 : vector<256xf32> to vector<1x256xf32>
    %cst_11 = arith.constant 1.600000e+01 : f32
    %16 = vector.broadcast %cst_11 : f32 to vector<1x256xf32>
    %17 = arith.divf %15, %16 : vector<1x256xf32>
    %18 = vector.broadcast %10 : vector<1x256xf32> to vector<16x256xf32>
    %19 = arith.subf %6, %18 : vector<16x256xf32>
    %cst_12 = arith.constant 9.99999997E-7 : f32
    %20 = vector.broadcast %cst_12 : f32 to vector<1x256xf32>
    %21 = arith.addf %17, %20 : vector<1x256xf32>
    %22 = math.rsqrt %21 : vector<1x256xf32>
    %23 = vector.broadcast %22 : vector<1x256xf32> to vector<16x256xf32>
    %24 = arith.mulf %19, %23 : vector<16x256xf32>
    %25 = vector.broadcast %4 : vector<16x1xf32> to vector<16x256xf32>
    %26 = arith.mulf %24, %25 : vector<16x256xf32>
    %27 = vector.broadcast %5 : vector<16x1xf32> to vector<16x256xf32>
    %28 = arith.addf %26, %27 : vector<16x256xf32>
    %29 = vector.extract_strided_slice %3 {offsets = [16, 0], sizes = [16, 256], strides = [1, 1]} : vector<32x256xf32> to vector<16x256xf32>
    %cst_13 = arith.constant dense<0.000000e+00> : vector<256xf32>
    %30 = vector.multi_reduction <add>, %29, %cst_13 [0] : vector<16x256xf32> to vector<256xf32>
    %31 = vector.shape_cast %30 : vector<256xf32> to vector<1x256xf32>
    %cst_14 = arith.constant 1.600000e+01 : f32
    %32 = vector.broadcast %cst_14 : f32 to vector<1x256xf32>
    %33 = arith.divf %31, %32 : vector<1x256xf32>
    %34 = vector.broadcast %33 : vector<1x256xf32> to vector<16x256xf32>
    %35 = arith.subf %29, %34 : vector<16x256xf32>
    %36 = arith.mulf %35, %35 : vector<16x256xf32>
    %cst_15 = arith.constant dense<0.000000e+00> : vector<256xf32>
    %37 = vector.multi_reduction <add>, %36, %cst_15 [0] : vector<16x256xf32> to vector<256xf32>
    %38 = vector.shape_cast %37 : vector<256xf32> to vector<1x256xf32>
    %cst_16 = arith.constant 1.600000e+01 : f32
    %39 = vector.broadcast %cst_16 : f32 to vector<1x256xf32>
    %40 = arith.divf %38, %39 : vector<1x256xf32>
    %41 = vector.broadcast %33 : vector<1x256xf32> to vector<16x256xf32>
    %42 = arith.subf %29, %41 : vector<16x256xf32>
    %cst_17 = arith.constant 9.99999997E-7 : f32
    %43 = vector.broadcast %cst_17 : f32 to vector<1x256xf32>
    %44 = arith.addf %40, %43 : vector<1x256xf32>
    %45 = math.rsqrt %44 : vector<1x256xf32>
    %46 = vector.broadcast %45 : vector<1x256xf32> to vector<16x256xf32>
    %47 = arith.mulf %42, %46 : vector<16x256xf32>
    %48 = vector.broadcast %4 : vector<16x1xf32> to vector<16x256xf32>
    %49 = arith.mulf %47, %48 : vector<16x256xf32>
    %50 = vector.broadcast %5 : vector<16x1xf32> to vector<16x256xf32>
    %51 = arith.addf %49, %50 : vector<16x256xf32>
    %c0_18 = arith.constant 0 : index
    %c0_19 = arith.constant 0 : index
    %c0_20 = arith.constant 0 : index
    %52 = vector.load %arg2[%c0_18, %c0_19, %c0_20] : memref<1x128x6xf32, #tpu.memory_space<vmem>>, vector<1x128x6xf32>
    %53 = vector.shape_cast %52 : vector<1x128x6xf32> to vector<128x6xf32>
    %c0_21 = arith.constant 0 : index
    %c0_22 = arith.constant 0 : index
    %54 = vector.load %arg5[%c0_21, %c0_22] : memref<6x16xf32, #tpu.memory_space<vmem>>, vector<6x16xf32>
    %cst_23 = arith.constant dense<0.000000e+00> : vector<128x16xf32>
    %55 = tpu.matmul %53, %54, %cst_23 {dimension_numbers = #tpu.dot_dimension_numbers<[1], [0], [0], [1], [0, 0, 1, 1], [], []>} : vector<128x6xf32>, vector<6x16xf32>, vector<128x16xf32> -> vector<128x16xf32>
    %c0_24 = arith.constant 0 : index
    %c0_25 = arith.constant 0 : index
    %56 = vector.load %arg9[%c0_24, %c0_25] : memref<1x16xf32, #tpu.memory_space<vmem>>, vector<1x16xf32>
    %c0_26 = arith.constant 0 : index
    %c0_27 = arith.constant 0 : index
    %57 = vector.load %arg10[%c0_26, %c0_27] : memref<1x16xf32, #tpu.memory_space<vmem>>, vector<1x16xf32>
    %cst_28 = arith.constant dense<0.000000e+00> : vector<128xf32>
    %58 = vector.multi_reduction <add>, %55, %cst_28 [1] : vector<128x16xf32> to vector<128xf32>
    %59 = vector.shape_cast %58 : vector<128xf32> to vector<128x1xf32>
    %cst_29 = arith.constant 1.600000e+01 : f32
    %60 = vector.broadcast %cst_29 : f32 to vector<128x1xf32>
    %61 = arith.divf %59, %60 : vector<128x1xf32>
    %62 = vector.broadcast %61 : vector<128x1xf32> to vector<128x16xf32>
    %63 = arith.subf %55, %62 : vector<128x16xf32>
    %64 = arith.mulf %63, %63 : vector<128x16xf32>
    %cst_30 = arith.constant dense<0.000000e+00> : vector<128xf32>
    %65 = vector.multi_reduction <add>, %64, %cst_30 [1] : vector<128x16xf32> to vector<128xf32>
    %66 = vector.shape_cast %65 : vector<128xf32> to vector<128x1xf32>
    %cst_31 = arith.constant 1.600000e+01 : f32
    %67 = vector.broadcast %cst_31 : f32 to vector<128x1xf32>
    %68 = arith.divf %66, %67 : vector<128x1xf32>
    %69 = vector.broadcast %61 : vector<128x1xf32> to vector<128x16xf32>
    %70 = arith.subf %55, %69 : vector<128x16xf32>
    %cst_32 = arith.constant 9.99999997E-7 : f32
    %71 = vector.broadcast %cst_32 : f32 to vector<128x1xf32>
    %72 = arith.addf %68, %71 : vector<128x1xf32>
    %73 = math.rsqrt %72 : vector<128x1xf32>
    %74 = vector.broadcast %73 : vector<128x1xf32> to vector<128x16xf32>
    %75 = arith.mulf %70, %74 : vector<128x16xf32>
    %76 = vector.broadcast %56 : vector<1x16xf32> to vector<128x16xf32>
    %77 = arith.mulf %75, %76 : vector<128x16xf32>
    %78 = vector.broadcast %57 : vector<1x16xf32> to vector<128x16xf32>
    %79 = arith.addf %77, %78 : vector<128x16xf32>
    %cst_33 = arith.constant 0.000000e+00 : f32
    %80 = vector.broadcast %cst_33 : f32 to vector<6x128xf32>
    %c0_34 = arith.constant 0 : index
    %c0_35 = arith.constant 0 : index
    %c0_36 = arith.constant 0 : index
    %81 = vector.load %arg8[%c0_34, %c0_35, %c0_36] : memref<2x16x1xf32, #tpu.memory_space<vmem>>, vector<1x16x1xf32>
    %82 = vector.shape_cast %81 : vector<1x16x1xf32> to vector<16x1xf32>
    %83 = vector.broadcast %82 : vector<16x1xf32> to vector<16x256xf32>
    %84 = arith.mulf %28, %83 : vector<16x256xf32>
    %cst_37 = arith.constant dense<0.000000e+00> : vector<128x256xf32>
    %85 = tpu.matmul %79, %84, %cst_37 {dimension_numbers = #tpu.dot_dimension_numbers<[1], [0], [0], [1], [0, 0, 1, 1], [], []>} : vector<128x16xf32>, vector<16x256xf32>, vector<128x256xf32> -> vector<128x256xf32>
    %cst_38 = arith.constant 0.353553385 : f32
    %86 = vector.broadcast %cst_38 : f32 to vector<128x256xf32>
    %87 = arith.mulf %85, %86 : vector<128x256xf32>
    %cst_39 = arith.constant dense<0xFF800000> : vector<128xf32>
    %88 = vector.multi_reduction <maximumf>, %87, %cst_39 [1] : vector<128x256xf32> to vector<128xf32>
    %89 = vector.shape_cast %88 : vector<128xf32> to vector<128x1xf32>
    %90 = vector.broadcast %89 : vector<128x1xf32> to vector<128x256xf32>
    %91 = arith.subf %87, %90 : vector<128x256xf32>
    %92 = math.exp %91 : vector<128x256xf32>
    %cst_40 = arith.constant dense<0.000000e+00> : vector<128xf32>
    %93 = vector.multi_reduction <add>, %92, %cst_40 [1] : vector<128x256xf32> to vector<128xf32>
    %94 = vector.shape_cast %93 : vector<128xf32> to vector<128x1xf32>
    %95 = tpu.reciprocal %94 {approx = true} : vector<128x1xf32> -> vector<128x1xf32>
    %96 = vector.broadcast %95 : vector<128x1xf32> to vector<128x256xf32>
    %97 = arith.mulf %92, %96 : vector<128x256xf32>
    %98 = vector.extract_strided_slice %51 {offsets = [0, 0], sizes = [8, 256], strides = [1, 1]} : vector<16x256xf32> to vector<8x256xf32>
    %cst_41 = arith.constant dense<0.000000e+00> : vector<8x128xf32>
    %99 = tpu.matmul %98, %97, %cst_41 {dimension_numbers = #tpu.dot_dimension_numbers<[1], [1], [0], [0], [0, 0, 1, 0], [], []>} : vector<8x256xf32>, vector<128x256xf32>, vector<8x128xf32> -> vector<8x128xf32>
    %c0_42 = arith.constant 0 : index
    %c0_43 = arith.constant 0 : index
    %c0_44 = arith.constant 0 : index
    %100 = vector.load %arg7[%c0_42, %c0_43, %c0_44] : memref<2x6x8xf32, #tpu.memory_space<vmem>>, vector<1x6x8xf32>
    %101 = vector.shape_cast %100 : vector<1x6x8xf32> to vector<6x8xf32>
    %cst_45 = arith.constant dense<0.000000e+00> : vector<6x128xf32>
    %102 = tpu.matmul %101, %99, %cst_45 {dimension_numbers = #tpu.dot_dimension_numbers<[1], [0], [0], [1], [0, 0, 1, 1], [], []>} : vector<6x8xf32>, vector<8x128xf32>, vector<6x128xf32> -> vector<6x128xf32>
    %103 = arith.addf %80, %102 : vector<6x128xf32>
    %c1 = arith.constant 1 : index
    %c0_46 = arith.constant 0 : index
    %c0_47 = arith.constant 0 : index
    %104 = vector.load %arg8[%c1, %c0_46, %c0_47] : memref<2x16x1xf32, #tpu.memory_space<vmem>>, vector<1x16x1xf32>
    %105 = vector.shape_cast %104 : vector<1x16x1xf32> to vector<16x1xf32>
    %106 = vector.broadcast %105 : vector<16x1xf32> to vector<16x256xf32>
    %107 = arith.mulf %28, %106 : vector<16x256xf32>
    %cst_48 = arith.constant dense<0.000000e+00> : vector<128x256xf32>
    %108 = tpu.matmul %79, %107, %cst_48 {dimension_numbers = #tpu.dot_dimension_numbers<[1], [0], [0], [1], [0, 0, 1, 1], [], []>} : vector<128x16xf32>, vector<16x256xf32>, vector<128x256xf32> -> vector<128x256xf32>
    %cst_49 = arith.constant 0.353553385 : f32
    %109 = vector.broadcast %cst_49 : f32 to vector<128x256xf32>
    %110 = arith.mulf %108, %109 : vector<128x256xf32>
    %cst_50 = arith.constant dense<0xFF800000> : vector<128xf32>
    %111 = vector.multi_reduction <maximumf>, %110, %cst_50 [1] : vector<128x256xf32> to vector<128xf32>
    %112 = vector.shape_cast %111 : vector<128xf32> to vector<128x1xf32>
    %113 = vector.broadcast %112 : vector<128x1xf32> to vector<128x256xf32>
    %114 = arith.subf %110, %113 : vector<128x256xf32>
    %115 = math.exp %114 : vector<128x256xf32>
    %cst_51 = arith.constant dense<0.000000e+00> : vector<128xf32>
    %116 = vector.multi_reduction <add>, %115, %cst_51 [1] : vector<128x256xf32> to vector<128xf32>
    %117 = vector.shape_cast %116 : vector<128xf32> to vector<128x1xf32>
    %118 = tpu.reciprocal %117 {approx = true} : vector<128x1xf32> -> vector<128x1xf32>
    %119 = vector.broadcast %118 : vector<128x1xf32> to vector<128x256xf32>
    %120 = arith.mulf %115, %119 : vector<128x256xf32>
    %121 = vector.extract_strided_slice %51 {offsets = [8, 0], sizes = [8, 256], strides = [1, 1]} : vector<16x256xf32> to vector<8x256xf32>
    %cst_52 = arith.constant dense<0.000000e+00> : vector<8x128xf32>
    %122 = tpu.matmul %121, %120, %cst_52 {dimension_numbers = #tpu.dot_dimension_numbers<[1], [1], [0], [0], [0, 0, 1, 0], [], []>} : vector<8x256xf32>, vector<128x256xf32>, vector<8x128xf32> -> vector<8x128xf32>
    %c1_53 = arith.constant 1 : index
    %c0_54 = arith.constant 0 : index
    %c0_55 = arith.constant 0 : index
    %123 = vector.load %arg7[%c1_53, %c0_54, %c0_55] : memref<2x6x8xf32, #tpu.memory_space<vmem>>, vector<1x6x8xf32>
    %124 = vector.shape_cast %123 : vector<1x6x8xf32> to vector<6x8xf32>
    %cst_56 = arith.constant dense<0.000000e+00> : vector<6x128xf32>
    %125 = tpu.matmul %124, %122, %cst_56 {dimension_numbers = #tpu.dot_dimension_numbers<[1], [0], [0], [1], [0, 0, 1, 1], [], []>} : vector<6x8xf32>, vector<8x128xf32>, vector<6x128xf32> -> vector<6x128xf32>
    %126 = arith.addf %103, %125 : vector<6x128xf32>
    %c0_57 = arith.constant 0 : index
    %c0_58 = arith.constant 0 : index
    %c0_59 = arith.constant 0 : index
    %127 = vector.load %arg4[%c0_57, %c0_58, %c0_59] : memref<1x6x128xf32, #tpu.memory_space<vmem>>, vector<1x6x128xf32>
    %128 = vector.shape_cast %127 : vector<1x6x128xf32> to vector<6x128xf32>
    %129 = arith.addf %126, %128 : vector<6x128xf32>
    %c0_60 = arith.constant 0 : index
    %c0_61 = arith.constant 0 : index
    %130 = vector.load %arg13[%c0_60, %c0_61] : memref<6x1xf32, #tpu.memory_space<vmem>>, vector<6x1xf32>
    %c0_62 = arith.constant 0 : index
    %c0_63 = arith.constant 0 : index
    %131 = vector.load %arg14[%c0_62, %c0_63] : memref<6x1xf32, #tpu.memory_space<vmem>>, vector<6x1xf32>
    %cst_64 = arith.constant dense<0.000000e+00> : vector<128xf32>
    %132 = vector.multi_reduction <add>, %129, %cst_64 [0] : vector<6x128xf32> to vector<128xf32>
    %133 = vector.shape_cast %132 : vector<128xf32> to vector<1x128xf32>
    %cst_65 = arith.constant 6.000000e+00 : f32
    %134 = vector.broadcast %cst_65 : f32 to vector<1x128xf32>
    %135 = arith.divf %133, %134 : vector<1x128xf32>
    %136 = vector.broadcast %135 : vector<1x128xf32> to vector<6x128xf32>
    %137 = arith.subf %129, %136 : vector<6x128xf32>
    %138 = arith.mulf %137, %137 : vector<6x128xf32>
    %cst_66 = arith.constant dense<0.000000e+00> : vector<128xf32>
    %139 = vector.multi_reduction <add>, %138, %cst_66 [0] : vector<6x128xf32> to vector<128xf32>
    %140 = vector.shape_cast %139 : vector<128xf32> to vector<1x128xf32>
    %cst_67 = arith.constant 6.000000e+00 : f32
    %141 = vector.broadcast %cst_67 : f32 to vector<1x128xf32>
    %142 = arith.divf %140, %141 : vector<1x128xf32>
    %143 = vector.broadcast %135 : vector<1x128xf32> to vector<6x128xf32>
    %144 = arith.subf %129, %143 : vector<6x128xf32>
    %cst_68 = arith.constant 9.99999997E-7 : f32
    %145 = vector.broadcast %cst_68 : f32 to vector<1x128xf32>
    %146 = arith.addf %142, %145 : vector<1x128xf32>
    %147 = math.rsqrt %146 : vector<1x128xf32>
    %148 = vector.broadcast %147 : vector<1x128xf32> to vector<6x128xf32>
    %149 = arith.mulf %144, %148 : vector<6x128xf32>
    %150 = vector.broadcast %130 : vector<6x1xf32> to vector<6x128xf32>
    %151 = arith.mulf %149, %150 : vector<6x128xf32>
    %152 = vector.broadcast %131 : vector<6x1xf32> to vector<6x128xf32>
    %153 = arith.addf %151, %152 : vector<6x128xf32>
    %cst_69 = arith.constant 0.000000e+00 : f32
    %154 = vector.broadcast %cst_69 : f32 to vector<6x128xf32>
    %155 = arith.maximumf %153, %154 : vector<6x128xf32>
    %c0_70 = arith.constant 0 : index
    %c0_71 = arith.constant 0 : index
    %c0_72 = arith.constant 0 : index
    %156 = vector.load %arg15[%c0_70, %c0_71, %c0_72] : memref<1x6x128xf32, #tpu.memory_space<vmem>>, vector<1x6x128xf32>
    %157 = vector.shape_cast %156 : vector<1x6x128xf32> to vector<6x128xf32>
    %158 = vector.shape_cast %155 : vector<6x128xf32> to vector<1x6x128xf32>
    tpu.vector_store %arg15[%c0_70, %c0_71, %c0_72], %158 {strides = array<i32>} : memref<1x6x128xf32, #tpu.memory_space<vmem>>, vector<1x6x128xf32>,
    return
  }
  func.func @transform_0(%arg0: i32, %arg1: i32) -> (i32, i32, i32) {
    %c0_i32 = arith.constant 0 : i32
    %c0_i32_0 = arith.constant 0 : i32
    return %arg0, %arg1, %c0_i32 : i32, i32, i32
  }
  func.func @transform_1(%arg0: i32, %arg1: i32) -> (i32, i32, i32) {
    %c0_i32 = arith.constant 0 : i32
    %c0_i32_0 = arith.constant 0 : i32
    %c0_i32_1 = arith.constant 0 : i32
    return %arg0, %c0_i32, %c0_i32_0 : i32, i32, i32
  }
  func.func @transform_2(%arg0: i32, %arg1: i32) -> (i32, i32, i32) {
    %c0_i32 = arith.constant 0 : i32
    %c0_i32_0 = arith.constant 0 : i32
    return %arg0, %c0_i32, %arg1 : i32, i32, i32
  }
  func.func @transform_3(%arg0: i32, %arg1: i32) -> (i32, i32) {
    %c0_i32 = arith.constant 0 : i32
    %c0_i32_0 = arith.constant 0 : i32
    %c0_i32_1 = arith.constant 0 : i32
    return %c0_i32, %c0_i32_0 : i32, i32
  }
  func.func @transform_4(%arg0: i32, %arg1: i32) -> (i32, i32) {
    %c0_i32 = arith.constant 0 : i32
    %c0_i32_0 = arith.constant 0 : i32
    %c0_i32_1 = arith.constant 0 : i32
    return %c0_i32, %c0_i32_0 : i32, i32
  }
  func.func @transform_5(%arg0: i32, %arg1: i32) -> (i32, i32, i32) {
    %c0_i32 = arith.constant 0 : i32
    %c0_i32_0 = arith.constant 0 : i32
    %c0_i32_1 = arith.constant 0 : i32
    %c0_i32_2 = arith.constant 0 : i32
    return %c0_i32, %c0_i32_0, %c0_i32_1 : i32, i32, i32
  }
  func.func @transform_6(%arg0: i32, %arg1: i32) -> (i32, i32, i32) {
    %c0_i32 = arith.constant 0 : i32
    %c0_i32_0 = arith.constant 0 : i32
    %c0_i32_1 = arith.constant 0 : i32
    %c0_i32_2 = arith.constant 0 : i32
    return %c0_i32, %c0_i32_0, %c0_i32_1 : i32, i32, i32
  }
  func.func @transform_7(%arg0: i32, %arg1: i32) -> (i32, i32) {
    %c0_i32 = arith.constant 0 : i32
    %c0_i32_0 = arith.constant 0 : i32
    %c0_i32_1 = arith.constant 0 : i32
    return %c0_i32, %c0_i32_0 : i32, i32
  }
  func.func @transform_8(%arg0: i32, %arg1: i32) -> (i32, i32) {
    %c0_i32 = arith.constant 0 : i32
    %c0_i32_0 = arith.constant 0 : i32
    %c0_i32_1 = arith.constant 0 : i32
    return %c0_i32, %c0_i32_0 : i32, i32
  }
  func.func @transform_9(%arg0: i32, %arg1: i32) -> (i32, i32) {
    %c0_i32 = arith.constant 0 : i32
    %c0_i32_0 = arith.constant 0 : i32
    %c0_i32_1 = arith.constant 0 : i32
    return %c0_i32, %c0_i32_0 : i32, i32
  }
  func.func @transform_10(%arg0: i32, %arg1: i32) -> (i32, i32) {
    %c0_i32 = arith.constant 0 : i32
    %c0_i32_0 = arith.constant 0 : i32
    %c0_i32_1 = arith.constant 0 : i32
    return %c0_i32, %c0_i32_0 : i32, i32
  }
  func.func @transform_11(%arg0: i32, %arg1: i32) -> (i32, i32) {
    %c0_i32 = arith.constant 0 : i32
    %c0_i32_0 = arith.constant 0 : i32
    %c0_i32_1 = arith.constant 0 : i32
    return %c0_i32, %c0_i32_0 : i32, i32
  }
  func.func @transform_12(%arg0: i32, %arg1: i32) -> (i32, i32) {
    %c0_i32 = arith.constant 0 : i32
    %c0_i32_0 = arith.constant 0 : i32
    %c0_i32_1 = arith.constant 0 : i32
    return %c0_i32, %c0_i32_0 : i32, i32
  }
  func.func @transform_13(%arg0: i32, %arg1: i32) -> (i32, i32, i32) {
    %c0_i32 = arith.constant 0 : i32
    %c0_i32_0 = arith.constant 0 : i32
    return %arg0, %c0_i32, %arg1 : i32, i32, i32
  }
}

</mosaic_0001>

<bundles_post_ra>
// kernel: tpu_custom_call.1
= control target key start
LH: loop header
LB: loop body
LE: loop exit
PB: predicated region body
PF: predicated region fallthrough
CT: control target
= control target key end

     0   :  { %s3169_s25 = smov 0   ;;  %s3171_s26 = smov 0   ;;  %s4345_s0 = inlined_call_operand.vmem [shape: f32[2,256,6], index: 0, kind: input, shape index: {}]   ;;  %s4346_s1 = inlined_call_operand.vmem [shape: f32[2,6,256], index: 1, kind: input, shape index: {}]   ;;  %s4347_s2 = inlined_call_operand.vmem [shape: f32[2,6,256], index: 2, kind: input, shape index: {}]   ;;  %s4348_s3 = inlined_call_operand.vmem [shape: f32[6,16], index: 3, kind: input, shape index: {}]   ;;  %s4349_s4 = inlined_call_operand.vmem [shape: f32[32,6], index: 4, kind: input, shape index: {}]   ;;  %s4350_s5 = inlined_call_operand.vmem [shape: f32[2,6,8], index: 5, kind: input, shape index: {}]   ;;  %s4351_s6 = inlined_call_operand.vmem [shape: f32[2,16,1], index: 6, kind: input, shape index: {}]   ;;  %s4352_s7 = inlined_call_operand.vmem [shape: f32[1,16], index: 7, kind: input, shape index: {}]   ;;  %s4353_s8 = inlined_call_operand.vmem [shape: f32[1,16], index: 8, kind: input, shape index: {}]   ;;  %s4354_s9 = inlined_call_operand.vmem [shape: f32[16,1], index: 9, kind: input, shape index: {}]   ;;  %s4355_s10 = inlined_call_operand.vmem [shape: f32[16,1], index: 10, kind: input, shape index: {}]   ;;  %s4356_s11 = inlined_call_operand.vmem [shape: f32[6,1], index: 11, kind: input, shape index: {}]   ;;  %s4357_s12 = inlined_call_operand.vmem [shape: f32[6,1], index: 12, kind: input, shape index: {}]   ;;  %s4358_s13 = inlined_call_operand.vmem [shape: f32[2,6,256], index: 13, kind: output, shape index: {}]  }
   0x1   :  { %s3173_s27 = smov 0   ;;  %s3175_s28 = smov 0  }
   0x2   :  { %s3177_s29 = smov 0  }
   0x3 LB: > { %s32_s30 = sadd.s32 1, %s3086_s27  ;;  %s35_s14 = sadd.s32 1, %s3090_s28  ;;  %s3094_s29 = sphi %s3177_s29, %s23_s29   ;;  %s3090_s28 = sphi %s3175_s28, %s4379_s28   ;;  %s3086_s27 = sphi %s3173_s27, %s4378_s27   ;;  %s3082_s26 = sphi %s3171_s26, %s4377_s26   ;;  %s3078_s25 = sphi %s3169_s25, %s4376_s25  }
   0x4   : > { %p33_p0 = scmp.ge.s32.totalorder %s32_s30, 2  ;;  %p2645_p1 = scmp.ge.s32.totalorder %s3094_s29, 1 }
   0x5   : > { %p433_p2 = scmp.lt.s32.totalorder %s3094_s29, 5 }
   0x6   : > { %s4381_s30 = smov (%p33_p0, %s32_s30), 0  ;;  %s4383_s14 = smov (!%p33_p0, %s35_s14), %s3090_s28 }
   0x7   : > { %p434_p3 = pnand %p2645_p1, %p433_p2  ;;  %p37_p4 = scmp.ge.s32.totalorder %s4383_s14, 2 }
   0x9   : > { %s4385_s14 = smov (%p37_p4, %s4383_s14), 0  ;;  %437 = sbr.rel (%p434_p3) target bundleno = 2364 (0x93c), region = 72 }
   0xe   : > { %s2646_s15 = sshll.u32 %s3078_s25, 4  ;;  %p498_p5 = scmp.lt.s32.totalorder %s3082_s26, 1  ;;  %v4359_v0 = vmov 0.0   ;;  %vm547_vm0 = vcmask 1045504   ;;  %v530_v1 = vld [vmem:[%s4349_s4] sm:$0xff]  ;;  %vm534_vm1 = vcmask 48128  }
   0xf   : > { %p500_p6 = scmp.lt.s32.totalorder %s2646_s15, 31  ;;  %618 = vmatprep.mubr.f32.mxu0 %v4359_v0  ;;  %v796_v2 = vld [vmem:[%s4348_s3] sm:$0x3f]  ;;  %v531_v5 = vld [vmem:[%s4349_s4 + $0x8] sm:$0xff]  ;;  %v532_v6 = vld [vmem:[%s4349_s4 + $0x10] sm:$0xff]  ;;  %v3097_v24 = vmov 0  }
  0x10   : > { %s4387_s26 = smov (!%p498_p5, %s3082_s26), 1  ;;  %v533_v7 = vld [vmem:[%s4349_s4 + $0x18] sm:$0xff]  ;;  %2821 = vset.pattern.permute.xlu1 %v3097_v24  ;;  %2820 = vset.pattern.permute.xlu0 %v3097_v24  ;;  %vm995_vm2 = vcmask 130048   ;;  %vm3098_vm3 = vmmov 0   ;;  %vm2338_vm4 = vcmask 64512   ;;  %p514_p7 = scmp.lt.s32.totalorder %s3078_s25, 1 }
  0x11   : > { %s2719_s16 = sshll.u32 %s4387_s26, 4  ;;  %s4389_s15 = smov (!%p500_p6, %s2646_s15), 31 }
  0x12   : > { %s511_s19 = scalar_lea.vmem %s4346_s1, %s2719_s16  ;;  %s2647_s24 = sshll.u32 %s4387_s26, 5 }
  0x13   : > { %v529_v3 = vld [vmem:[%s511_s19 + $0x8] sm:$0x3f]  ;;  %v528_v4 = vld [vmem:[%s511_s19] sm:$0x3f]  ;;  %s503_s16 = sadd.s32 %s2647_s24, %s4389_s15  ;;  %s4391_s25 = smov (!%p514_p7, %s3078_s25), 1 }
  0x14   : > { %2655 = vmatprep.subr.msk.mxu0 %vm547_vm0, %v529_v3  ;;  %s2648_s19 = sshll.u32 %s503_s16, 3  ;;  %s2651_s24 = sshll.u32 %s4387_s26, 1 }
  0x15   : > { %2656 = vmatpush1.msk.msra.mxu0 %vm547_vm0, %v528_v4  ;;  %s3233_s15 = scalar_lea.vmem %s4345_s0, %s2648_s19  ;;  %s4315_s16 = sadd.s32 %s2651_s24, %s4391_s25 }
  0x16   : > { %2657 = vmatmul.mubr.msk.f32.vlgmr.msra.gmra.mxu0 %vm534_vm1, %v530_v1  ;;  %2741 = vmatprep.subr.msk.mxu0 %vm547_vm0, %v796_v2  ;;  %v780_v8 = vld [vmem:[%s3233_s15] sm:$0xff]  ;;  %v781_v9 = vld [vmem:[%s3233_s15 + $0x8] sm:$0xff]  ;;  %v782_v10 = vld [vmem:[%s3233_s15 + $0x10] sm:$0xff]  ;;  %s2652_s17 = sshll.u32 %s4315_s16, 3 }
  0x17   : > { %624 = vmatprep.mubr.f32.mxu0 %v4359_v0  ;;  %2742 = vmatpush3.msk.msra.mxu0 %vm547_vm0, %v796_v2  ;;  %v783_v11 = vld [vmem:[%s3233_s15 + $0x18] sm:$0xff]  ;;  %v784_v12 = vld [vmem:[%s3233_s15 + $0x20] sm:$0xff]  ;;  %v785_v13 = vld [vmem:[%s3233_s15 + $0x28] sm:$0xff]  ;;  %s519_s20 = scalar_lea.vmem %s4347_s2, %s2652_s17  ;;  %s527_s21 = scalar_lea.vmem %s4358_s13, %s2652_s17 }
  0x18   : > { %v786_v14 = vld [vmem:[%s3233_s15 + $0x30] sm:$0xff]  ;;  %v787_v15 = vld [vmem:[%s3233_s15 + $0x38] sm:$0xff]  ;;  %v788_v16 = vld [vmem:[%s3233_s15 + $0x40] sm:$0xff] }
  0x19   : > { %v789_v17 = vld [vmem:[%s3233_s15 + $0x48] sm:$0xff]  ;;  %v790_v18 = vld [vmem:[%s3233_s15 + $0x50] sm:$0xff]  ;;  %v791_v19 = vld [vmem:[%s3233_s15 + $0x58] sm:$0xff] }
  0x1a   : > { %2658 = vmatmul.mubr.msk.f32.gmra.mxu0 %vm534_vm1, %v531_v5  ;;  %v792_v20 = vld [vmem:[%s3233_s15 + $0x60] sm:$0xff]  ;;  %v793_v21 = vld [vmem:[%s3233_s15 + $0x68] sm:$0xff]  ;;  %v794_v22 = vld [vmem:[%s3233_s15 + $0x70] sm:$0xff] }
  0x1b   : > { %630 = vmatprep.mubr.f32.mxu0 %v4359_v0  ;;  %v795_v23 = vld [vmem:[%s3233_s15 + $0x78] sm:$0xff] }
  0x1e   : > { %2659 = vmatmul.mubr.msk.f32.gmra.mxu0 %vm534_vm1, %v532_v6 }
  0x1f   : > { %636 = vmatprep.mubr.f32.mxu0 %v4359_v0 }
  0x22   : > { %2660 = vmatmul.mubr.msk.f32.gmra.mxu0 %vm534_vm1, %v533_v7 }
  0x23   : > { %2743 = vmatprep.mubr.msk.f32.mxu0 %vm534_vm1, %v780_v8 }
  0x26   : > { %2744 = vmatmul.mubr.msk.f32.vlgmr.msra.gmra.mxu0 %vm534_vm1, %v781_v9 }
  0x27   : > { %2746 = vmatprep.mubr.msk.f32.mxu0 %vm534_vm1, %v782_v10 }
  0x2a   : > { %2747 = vmatmul.mubr.msk.f32.gmra.mxu0 %vm534_vm1, %v783_v11 }
  0x2b   : > { %2749 = vmatprep.mubr.msk.f32.mxu0 %vm534_vm1, %v784_v12 }
  0x2e   : > { %2750 = vmatmul.mubr.msk.f32.gmra.mxu0 %vm534_vm1, %v785_v13 }
  0x2f   : > { %2752 = vmatprep.mubr.msk.f32.mxu0 %vm534_vm1, %v786_v14 }
  0x32   : > { %2753 = vmatmul.mubr.msk.f32.gmra.mxu0 %vm534_vm1, %v787_v15 }
  0x33   : > { %2755 = vmatprep.mubr.msk.f32.mxu0 %vm534_vm1, %v788_v16 }
  0x36   : > { %2756 = vmatmul.mubr.msk.f32.gmra.mxu0 %vm534_vm1, %v789_v17 }
  0x37   : > { %2758 = vmatprep.mubr.msk.f32.mxu0 %vm534_vm1, %v790_v18 }
  0x3a   : > { %2759 = vmatmul.mubr.msk.f32.gmra.mxu0 %vm534_vm1, %v791_v19 }
  0x3b   : > { %2761 = vmatprep.mubr.msk.f32.mxu0 %vm534_vm1, %v792_v20 }
  0x3e   : > { %2762 = vmatmul.mubr.msk.f32.gmra.mxu0 %vm534_vm1, %v793_v21 }
  0x3f   : > { %2764 = vmatprep.mubr.msk.f32.mxu0 %vm534_vm1, %v794_v22 }
  0x42   : > { %2765 = vmatmul.mubr.msk.f32.gmra.mxu0 %vm534_vm1, %v795_v23 }
  0x43   : > { %1376 = vmatprep.mubr.f32.mxu0 %v4359_v0 }
  0xd6   : > { %v620_v25 = vpop.f32.mrf.mxu0 }
  0xd8   : > { %v622_v26 = vpop.f32.mrf.mxu0 }
  0xda   : > { %v626_v27 = vpop.f32.mrf.mxu0 }
  0xdb   : > { %v647_v28 = vadd.f32 %v626_v27, %v620_v25 }
  0xdc   : > { %v628_v29 = vpop.f32.mrf.mxu0 }
  0xdd   : > { %v648_v30 = vrot.slane %v647_v28, 4  ;;  %v654_v31 = vadd.f32 %v628_v29, %v622_v26 }
  0xde   : > { %v632_v32 = vpop.f32.mrf.mxu0 }
  0xdf   : > { %v649_v33 = vadd.f32 %v648_v30, %v647_v28  ;;  %v655_v34 = vrot.slane %v654_v31, 4 }
  0xe0   : > { %v634_v35 = vpop.f32.mrf.mxu0 }
  0xe1   : > { %v650_v36 = vrot.slane %v649_v33, 2  ;;  %v656_v37 = vadd.f32 %v655_v34, %v654_v31 }
  0xe2   : > { %v638_v38 = vpop.f32.mrf.mxu0 }
  0xe3   : > { %v651_v39 = vadd.f32 %v650_v36, %v649_v33  ;;  %v657_v40 = vrot.slane %v656_v37, 2  ;;  %v724_v41 = vadd.f32 %v638_v38, %v632_v32 }
  0xe4   : > { %v640_v42 = vpop.f32.mrf.mxu0 }
  0xe5   : > { %v652_v43 = vrot.slane %v651_v39, 1  ;;  %v658_v44 = vadd.f32 %v657_v40, %v656_v37  ;;  %v725_v45 = vrot.slane %v724_v41, 4  ;;  %v731_v46 = vadd.f32 %v640_v42, %v634_v35 }
  0xe6   : > { %v3274_v47 = vpop.f32.mrf.mxu0 }
  0xe7   : > { %v653_v48 = vadd.f32 %v652_v43, %v651_v39  ;;  %v659_v49 = vrot.slane %v658_v44, 1  ;;  %v726_v50 = vadd.f32 %v725_v45, %v724_v41  ;;  %v732_v51 = vrot.slane %v731_v46, 4 }
  0xe8   : > { %v999_v52 = vsel %vm995_vm2, %v3274_v47, 0.0  ;;  %v3278_v53 = vpop.f32.mrf.mxu0 }
  0xe9   : > { %v662_v54 = vmul.f32 0.0625, %v653_v48  ;;  %v660_v55 = vadd.f32 %v659_v49, %v658_v44  ;;  %v727_v56 = vrot.slane %v726_v50, 2  ;;  %v733_v57 = vadd.f32 %v732_v51, %v731_v46  ;;  %1000 = vadd.xlane.f32.xlu0 %v999_v52 }
  0xea   : > { %v3280_v58 = vpop.f32.mrf.mxu0  ;;  %v996_v1 = vsel %vm995_vm2, %v3278_v53, 0.0 }
  0xeb   : > { %v3282_v59 = vsub.f32 %v620_v25, %v662_v54  ;;  %v3284_v60 = vsub.f32 %v626_v27, %v662_v54  ;;  %v663_v61 = vmul.f32 0.0625, %v660_v55  ;;  %v728_v62 = vadd.f32 %v727_v56, %v726_v50  ;;  %v643_v54 = vld [vmem:[%s4354_s9] sm:$0xff]  ;;  %v644_v55 = vld [vmem:[%s4354_s9 + $0x8] sm:$0xff] }
  0xec   : > { %v734_v63 = vrot.slane %v733_v57, 2  ;;  %v1005_v2 = vsel %vm995_vm2, %v3280_v58, 0.0  ;;  %v3290_v3 = vpop.f32.mrf.mxu0 }
  0xed   : > { %v668_v4 = vmul.f32 %v3282_v59, %v3282_v59  ;;  %v670_v5 = vmul.f32 %v3284_v60, %v3284_v60  ;;  %v3296_v6 = vsub.f32 %v622_v26, %v663_v61  ;;  %v3298_v7 = vsub.f32 %v628_v29, %v663_v61  ;;  %997 = vadd.xlane.f32.xlu0 %v996_v1 }
  0xee   : > { %v729_v8 = vrot.slane %v728_v62, 1  ;;  %v735_v9 = vadd.f32 %v734_v63, %v733_v57  ;;  %1006 = vadd.xlane.f32.xlu1 %v1005_v2  ;;  %v1002_v13 = vsel %vm995_vm2, %v3290_v3, 0.0 }
  0xef   : > { %v672_v10 = vadd.f32 %v670_v5, %v668_v4  ;;  %v669_v11 = vmul.f32 %v3296_v6, %v3296_v6  ;;  %v671_v12 = vmul.f32 %v3298_v7, %v3298_v7  ;;  %v3312_v4 = vpop.f32.mrf.mxu0 }
  0xf0   : > { %v730_v14 = vadd.f32 %v729_v8, %v728_v62  ;;  %v736_v15 = vrot.slane %v735_v9, 1 }
  0xf1   : > { %v673_v16 = vrot.slane %v672_v10, 4  ;;  %v679_v17 = vadd.f32 %v671_v12, %v669_v11 }
  0xf2   : > { %v738_v18 = vmul.f32 0.0625, %v730_v14  ;;  %v737_v19 = vadd.f32 %v736_v15, %v735_v9  ;;  %1003 = vadd.xlane.f32.xlu1 %v1002_v13 }
  0xf3   : > { %v674_v20 = vadd.f32 %v673_v16, %v672_v10  ;;  %v680_v21 = vrot.slane %v679_v17, 4  ;;  %v3314_v10 = vpop.f32.mrf.mxu0 }
  0xf4   : > { %v740_v22 = vsub.f32 %v632_v32, %v738_v18  ;;  %v742_v23 = vsub.f32 %v638_v38, %v738_v18  ;;  %v739_v24 = vmul.f32 0.0625, %v737_v19 }
  0xf5   : > { %v675_v25 = vrot.slane %v674_v20, 2  ;;  %v681_v26 = vadd.f32 %v680_v21, %v679_v17  ;;  %v3316_v11 = vpop.f32.mrf.mxu0 }
  0xf6   : > { %v744_v27 = vmul.f32 %v740_v22, %v740_v22  ;;  %v746_v28 = vmul.f32 %v742_v23, %v742_v23  ;;  %v741_v29 = vsub.f32 %v634_v35, %v739_v24  ;;  %v743_v30 = vsub.f32 %v640_v42, %v739_v24 }
  0xf7   : > { %v676_v31 = vadd.f32 %v675_v25, %v674_v20  ;;  %v682_v33 = vrot.slane %v681_v26, 2  ;;  %v3324_v16 = vpop.f32.mrf.mxu0 }
  0xf8   : > { %v748_v34 = vadd.f32 %v746_v28, %v744_v27  ;;  %v745_v36 = vmul.f32 %v741_v29, %v741_v29  ;;  %v747_v37 = vmul.f32 %v743_v30, %v743_v30 }
  0xf9   : > { %v677_v39 = vrot.slane %v676_v31, 1  ;;  %v683_v40 = vadd.f32 %v682_v33, %v681_v26  ;;  %v3332_v19 = vpop.f32.mrf.mxu0 }
  0xfa   : > { %v749_v41 = vrot.slane %v748_v34, 4  ;;  %v755_v43 = vadd.f32 %v747_v37, %v745_v36 }
  0xfb   : > { %v678_v44 = vadd.f32 %v677_v39, %v676_v31  ;;  %v684_v45 = vrot.slane %v683_v40, 1 }
  0xfc   : > { %v750_v32 = vadd.f32 %v749_v41, %v748_v34  ;;  %v756_v38 = vrot.slane %v755_v43, 4  ;;  %v1023_v34 = vsel %vm995_vm2, %v3332_v19, 0.0 }
  0xfd   : > { %v686_v46 = vmul.f32 0.0625, %v678_v44  ;;  %v685_v48 = vadd.f32 %v684_v45, %v683_v40 }
  0xfe   : > { %v751_v49 = vrot.slane %v750_v32, 2  ;;  %v757_v50 = vadd.f32 %v756_v38, %v755_v43 }
  0xff   : > { %v688_v51 = vadd.f32 1e-06, %v686_v46  ;;  %v687_v35 = vmul.f32 0.0625, %v685_v48 }
 0x100   : > { %v752_v42 = vadd.f32 %v751_v49, %v750_v32  ;;  %v758_v52 = vrot.slane %v757_v50, 2 }
 0x101   : > { %2822 = vrsqrt.f32 %v688_v51  ;;  %v689_v56 = vadd.f32 1e-06, %v687_v35 }
 0x102   : > { %v753_v57 = vrot.slane %v752_v42, 1  ;;  %v759_v61 = vadd.f32 %v758_v52, %v757_v50 }
 0x103   : > { %2824 = vrsqrt.f32 %v689_v56  ;;  %698 = vperm.xlu1 %2821, %v643_v54   ;;  %703 = vperm.xlu0 %2820, %v644_v55  }
 0x104   : > { %v754_v62 = vadd.f32 %v753_v57, %v752_v42  ;;  %v760_v63 = vrot.slane %v759_v61, 1 }
 0x106   : > { %v762_v1 = vmul.f32 0.0625, %v754_v62  ;;  %v761_v2 = vadd.f32 %v760_v63, %v759_v61 }
 0x108   : > { %v764_v5 = vadd.f32 1e-06, %v762_v1  ;;  %v763_v8 = vmul.f32 0.0625, %v761_v2 }
 0x10a   : > { %2826 = vrsqrt.f32 %v764_v5  ;;  %v765_v9 = vadd.f32 1e-06, %v763_v8  ;;  %v646_v8 = vld [vmem:[%s4355_s10 + $0x8] sm:$0xff] }
 0x10c   : > { %2828 = vrsqrt.f32 %v765_v9 }
 0x10e   : > { %v2823_v12 = vpop.eup %2822 }
 0x10f   : > { %v3319_v13 = vmul.f32 %v2823_v12, %v3284_v60  ;;  %v3322_v14 = vmul.f32 %v2823_v12, %v3282_v59  ;;  %v3336_v60 = vpop.f32.mrf.mxu0 }
 0x110   : > { %v2825_v15 = vpop.eup %2824 }
 0x111   : > { %v3327_v17 = vmul.f32 %v2825_v15, %v3298_v7  ;;  %v3330_v18 = vmul.f32 %v2825_v15, %v3296_v6  ;;  %v3340_v27 = vpop.f32.mrf.mxu0  ;;  %v1008_v6 = vsel %vm995_vm2, %v3314_v10, 0.0  ;;  %v1014_v7 = vsel %vm995_vm2, %v3324_v16, 0.0 }
 0x112   : > { %v1029_v39 = vsel %vm995_vm2, %v3340_v27, 0.0 }
 0x113   : > { %v3342_v28 = vpop.f32.mrf.mxu0 }
 0x114   : > { %v1026_v33 = vsel %vm995_vm2, %v3342_v28, 0.0 }
 0x117   : > { %v2827_v20 = vpop.eup %2826 }
 0x118   : > { %v3334_v21 = vmul.f32 %v2827_v20, %v740_v22  ;;  %v770_v24 = vmul.f32 %v2827_v20, %v742_v23  ;;  %v3348_v22 = vpop.f32.mrf.mxu0  ;;  %v1011_v23 = vsel %vm995_vm2, %v3312_v4, 0.0 }
 0x119   : > { %v2829_v25 = vpop.eup %2828  ;;  %v1035_v43 = vsel %vm995_vm2, %v3348_v22, 0.0 }
 0x11a   : > { %v771_v59 = vmul.f32 %v2829_v25, %v743_v30  ;;  %v3338_v26 = vmul.f32 %v2829_v25, %v741_v29  ;;  %v1020_v29 = vsel %vm995_vm2, %v3336_v60, 0.0  ;;  %v1017_v30 = vsel %vm995_vm2, %v3316_v11, 0.0  ;;  %v3356_v31 = vpop.f32.mrf.mxu0 }
 0x11b   : > { %v1032_v37 = vsel %vm995_vm2, %v3356_v31, 0.0 }
 0x11c   : > { %v3362_v36 = vpop.f32.mrf.mxu0 }
 0x11d   : > { %v1041_v44 = vsel %vm995_vm2, %v3362_v36, 0.0 }
 0x11e   : > { %v3368_v40 = vpop.f32.mrf.mxu0 }
 0x11f   : > { %v1038_v41 = vsel %vm995_vm2, %v3368_v40, 0.0 }
 0x122   : > { %1009 = vadd.xlane.f32.xlu0 %v1008_v6 }
 0x126   : > { %1015 = vadd.xlane.f32.xlu0 %v1014_v7 }
 0x127   : > { %1012 = vadd.xlane.f32.xlu1 %v1011_v23 }
 0x12a   : > { %1021 = vadd.xlane.f32.xlu0 %v1020_v29 }
 0x12b   : > { %1018 = vadd.xlane.f32.xlu1 %v1017_v30 }
 0x12e   : > { %1027 = vadd.xlane.f32.xlu0 %v1026_v33 }
 0x12f   : > { %1024 = vadd.xlane.f32.xlu1 %v1023_v34 }
 0x132   : > { %1033 = vadd.xlane.f32.xlu0 %v1032_v37 }
 0x133   : > { %1030 = vadd.xlane.f32.xlu1 %v1029_v39 }
 0x136   : > { %1039 = vadd.xlane.f32.xlu0 %v1038_v41 }
 0x137   : > { %1036 = vadd.xlane.f32.xlu1 %v1035_v43 }
 0x13b   : > { %1042 = vadd.xlane.f32.xlu1 %v1041_v44 }
 0x172   : > { %v1001_v45 = vpop.xlane.xlu0 %1000 }
 0x173   : > { %v1045_v32 = vmul.f32 0.0625, %v1001_v45 }
 0x175   : > { %v3377_v38 = vsub.f32 %v3274_v47, %v1045_v32 }
 0x176   : > { %v998_v46 = vpop.xlane.xlu0 %997 }
 0x177   : > { %v1044_v48 = vmul.f32 0.0625, %v998_v46  ;;  %v1007_v49 = vpop.xlane.xlu1 %1006  ;;  %v1077_v50 = vmul.f32 %v3377_v38, %v3377_v38 }
 0x178   : > { %v1047_v51 = vmul.f32 0.0625, %v1007_v49 }
 0x179   : > { %v3382_v35 = vsub.f32 %v3278_v53, %v1044_v48  ;;  %v1095_v42 = vsel %vm995_vm2, %v1077_v50, 0.0 }
 0x17a   : > { %v3386_v52 = vsub.f32 %v3280_v58, %v1047_v51  ;;  %1096 = vadd.xlane.f32.xlu1 %v1095_v42 }
 0x17b   : > { %v1004_v54 = vpop.xlane.xlu1 %1003  ;;  %v1076_v47 = vmul.f32 %v3382_v35, %v3382_v35 }
 0x17c   : > { %v1046_v55 = vmul.f32 0.0625, %v1004_v54  ;;  %v1079_v56 = vmul.f32 %v3386_v52, %v3386_v52 }
 0x17d   : > { %v1092_v57 = vsel %vm995_vm2, %v1076_v47, 0.0 }
 0x17e   : > { %v3394_v61 = vsub.f32 %v3290_v3, %v1046_v55  ;;  %v704_v53 = vpop.permute.xlu0 %703  ;;  %v1101_v62 = vsel %vm995_vm2, %v1079_v56, 0.0  ;;  %1093 = vadd.xlane.f32.xlu0 %v1092_v57 }
 0x17f   : > { %v3397_v58 = vmul.f32 %v770_v24, %v704_v53  ;;  %v3399_v63 = vmul.f32 %v771_v59, %v704_v53  ;;  %1102 = vadd.xlane.f32.xlu1 %v1101_v62  ;;  %v3402_v1 = vmul.f32 %v704_v53, %v3319_v13  ;;  %v3405_v2 = vmul.f32 %v704_v53, %v3327_v17  ;;  %v3413_v12 = vpop.permute.xlu1 %698 }
 0x180   : > { %v1078_v5 = vmul.f32 %v3394_v61, %v3394_v61 }
 0x182   : > { %v1098_v3 = vsel %vm995_vm2, %v1078_v5, 0.0  ;;  %v1249_v5 = vld [vmem:[%s4351_s6 + $0x8] sm:$0xff] }
 0x183   : > { %1099 = vadd.xlane.f32.xlu0 %v1098_v3 }
 0x190   : > { %717 = vperm.xlu1 %2821, %v646_v8  }
 0x1ab   : > { %v1010_v9 = vpop.xlane.xlu0 %1009 }
 0x1ac   : > { %v1048_v15 = vmul.f32 0.0625, %v1010_v9 }
 0x1ae   : > { %v3416_v13 = vsub.f32 %v3314_v10, %v1048_v15 }
 0x1af   : > { %v1016_v17 = vpop.xlane.xlu0 %1015 }
 0x1b0   : > { %v1013_v20 = vpop.xlane.xlu1 %1012  ;;  %v1050_v24 = vmul.f32 0.0625, %v1016_v17  ;;  %v1080_v25 = vmul.f32 %v3416_v13, %v3416_v13  ;;  %v1248_v17 = vld [vmem:[%s4351_s6] sm:$0xff] }
 0x1b1   : > { %v1049_v59 = vmul.f32 0.0625, %v1013_v20 }
 0x1b2   : > { %v1104_v6 = vsel %vm995_vm2, %v1080_v25, 0.0  ;;  %v3425_v23 = vsub.f32 %v3324_v16, %v1050_v24 }
 0x1b3   : > { %v3422_v7 = vsub.f32 %v3312_v4, %v1049_v59  ;;  %v1022_v29 = vpop.xlane.xlu0 %1021  ;;  %1105 = vadd.xlane.f32.xlu0 %v1104_v6 }
 0x1b4   : > { %v1019_v30 = vpop.xlane.xlu1 %1018  ;;  %v1052_v10 = vmul.f32 0.0625, %v1022_v29  ;;  %v1082_v39 = vmul.f32 %v3425_v23, %v3425_v23 }
 0x1b5   : > { %v1081_v33 = vmul.f32 %v3422_v7, %v3422_v7 }
 0x1b6   : > { %v3430_v34 = vsub.f32 %v3336_v60, %v1052_v10  ;;  %v1110_v45 = vsel %vm995_vm2, %v1082_v39, 0.0 }
 0x1b7   : > { %v1107_v37 = vsel %vm995_vm2, %v1081_v33, 0.0  ;;  %v1028_v41 = vpop.xlane.xlu0 %1027 }
 0x1b8   : > { %v1025_v4 = vpop.xlane.xlu1 %1024  ;;  %1108 = vadd.xlane.f32.xlu1 %v1107_v37  ;;  %v1054_v44 = vmul.f32 0.0625, %v1028_v41  ;;  %v1084_v32 = vmul.f32 %v3430_v34, %v3430_v34  ;;  %v1051_v37 = vmul.f32 0.0625, %v1019_v30 }
 0x1b9   : > { %v1053_v16 = vmul.f32 0.0625, %v1025_v4 }
 0x1ba   : > { %v3442_v46 = vsub.f32 %v3342_v28, %v1054_v44  ;;  %v1116_v49 = vsel %vm995_vm2, %v1084_v32, 0.0  ;;  %v645_v28 = vld [vmem:[%s4355_s10] sm:$0xff]  ;;  %v3491_v39 = vsub.f32 %v3316_v11, %v1051_v37 }
 0x1bb   : > { %v3436_v43 = vsub.f32 %v3332_v19, %v1053_v16  ;;  %v1034_v51 = vpop.xlane.xlu0 %1033 }
 0x1bc   : > { %v1031_v60 = vpop.xlane.xlu1 %1030  ;;  %1111 = vadd.xlane.f32.xlu1 %v1110_v45  ;;  %v1056_v42 = vmul.f32 0.0625, %v1034_v51  ;;  %v1086_v47 = vmul.f32 %v3442_v46, %v3442_v46 }
 0x1bd   : > { %v1055_v48 = vmul.f32 0.0625, %v1031_v60  ;;  %v1085_v50 = vmul.f32 %v3436_v43, %v3436_v43 }
 0x1be   : > { %v3457_v56 = vsub.f32 %v3356_v31, %v1056_v42  ;;  %v1122_v53 = vsel %vm995_vm2, %v1086_v47, 0.0 }
 0x1bf   : > { %v3448_v19 = vsub.f32 %v3340_v27, %v1055_v48  ;;  %v1119_v54 = vsel %vm995_vm2, %v1085_v50, 0.0  ;;  %v1040_v62 = vpop.xlane.xlu0 %1039 }
 0x1c0   : > { %1117 = vadd.xlane.f32.xlu1 %v1116_v49  ;;  %v1037_v55 = vpop.xlane.xlu1 %1036  ;;  %v1058_v8 = vmul.f32 0.0625, %v1040_v62  ;;  %v1088_v9 = vmul.f32 %v3457_v56, %v3457_v56  ;;  %v772_v62 = vmul.f32 %v3334_v21, %v3413_v12  ;;  %v3518_v21 = vld [vmem:[%s4352_s7] ss:$0 sm:$0xff] }
 0x1c1   : > { %v1057_v57 = vmul.f32 0.0625, %v1037_v55  ;;  %v1087_v27 = vmul.f32 %v3448_v19, %v3448_v19 }
 0x1c2   : > { %v3475_v20 = vsub.f32 %v3368_v40, %v1058_v8 }
 0x1c3   : > { %v3466_v3 = vsub.f32 %v3348_v22, %v1057_v57  ;;  %v1125_v31 = vsel %vm995_vm2, %v1087_v27, 0.0  ;;  %v1128_v22 = vsel %vm995_vm2, %v1088_v9, 0.0 }
 0x1c4   : > { %1120 = vadd.xlane.f32.xlu1 %v1119_v54  ;;  %v1043_v15 = vpop.xlane.xlu1 %1042  ;;  %v1090_v29 = vmul.f32 %v3475_v20, %v3475_v20 }
 0x1c5   : > { %v1059_v24 = vmul.f32 0.0625, %v1043_v15  ;;  %v1089_v25 = vmul.f32 %v3466_v3, %v3466_v3 }
 0x1c6   : > { %v1134_v40 = vsel %vm995_vm2, %v1090_v29, 0.0 }
 0x1c7   : > { %v3481_v59 = vsub.f32 %v3362_v36, %v1059_v24  ;;  %v1131_v6 = vsel %vm995_vm2, %v1089_v25, 0.0  ;;  %v1083_v36 = vmul.f32 %v3491_v39, %v3491_v39 }
 0x1c8   : > { %1123 = vadd.xlane.f32.xlu1 %v1122_v53 }
 0x1c9   : > { %712 = vperm.xlu0 %2820, %v645_v28   ;;  %v1091_v10 = vmul.f32 %v3481_v59, %v3481_v59  ;;  %v1113_v4 = vsel %vm995_vm2, %v1083_v36, 0.0 }
 0x1cb   : > { %v1137_v33 = vsel %vm995_vm2, %v1091_v10, 0.0 }
 0x1cc   : > { %1126 = vadd.xlane.f32.xlu1 %v1125_v31 }
 0x1cd   : > { %1257 = vperm.xlu0 %2820, %v1249_v5  }
 0x1d0   : > { %1129 = vadd.xlane.f32.xlu1 %v1128_v22 }
 0x1d1   : > { %1252 = vperm.xlu0 %2820, %v1248_v17  }
 0x1d4   : > { %1132 = vadd.xlane.f32.xlu1 %v1131_v6 }
 0x1d8   : > { %1135 = vadd.xlane.f32.xlu1 %v1134_v40  ;;  %v707_v40 = vmul.f32 %v3413_v12, %v3330_v18  ;;  %v3537_v18 = vld [vmem:[%s4353_s8] ss:$0 sm:$0xff] }
 0x1dc   : > { %1138 = vadd.xlane.f32.xlu1 %v1137_v33 }
 0x1f0   : > { %1114 = vadd.xlane.f32.xlu0 %v1113_v4 }
 0x203   : > { %v1097_v41 = vpop.xlane.xlu1 %1096 }
 0x204   : > { %v1141_v48 = vmul.f32 0.0625, %v1097_v41 }
 0x206   : > { %v1157_v50 = vadd.f32 1e-06, %v1141_v48 }
 0x207   : > { %v1094_v60 = vpop.xlane.xlu0 %1093 }
 0x208   : > { %v1103_v16 = vpop.xlane.xlu1 %1102  ;;  %v1140_v30 = vmul.f32 0.0625, %v1094_v60 }
 0x209   : > { %v1143_v42 = vmul.f32 0.0625, %v1103_v16 }
 0x20a   : > { %v1156_v11 = vadd.f32 1e-06, %v1140_v30 }
 0x20b   : > { %v1159_v55 = vadd.f32 1e-06, %v1143_v42 }
 0x20c   : > { %v718_v44 = vpop.permute.xlu1 %717  ;;  %v1100_v49 = vpop.xlane.xlu0 %1099  ;;  %2830 = vrsqrt.f32 %v1156_v11 }
 0x20d   : > { %v3497_v45 = vadd.f32 %v3397_v58, %v718_v44  ;;  %v3500_v32 = vadd.f32 %v3399_v63, %v718_v44  ;;  %v1142_v51 = vmul.f32 0.0625, %v1100_v49  ;;  %2832 = vrsqrt.f32 %v1157_v50 }
 0x20e   : > { %v773_v63 = vmul.f32 %v3338_v26, %v3413_v12  ;;  %v3510_v17 = vadd.f32 %v718_v44, %v3402_v1  ;;  %v3513_v25 = vadd.f32 %v718_v44, %v3405_v2  ;;  %v706_v1 = vmul.f32 %v3413_v12, %v3322_v14 }
 0x20f   : > { %4365 = vst [vmem:[#allocation2_spill] sm:$0xff] %v3497_v45  ;;  %v1158_v54 = vadd.f32 1e-06, %v1142_v51 }
 0x211   : > { %2834 = vrsqrt.f32 %v1158_v54 }
 0x212   : > { %2836 = vrsqrt.f32 %v1159_v55 }
 0x219   : > { %v2831_v57 = vpop.eup %2830 }
 0x21a   : > { %v1188_v15 = vmul.f32 %v2831_v57, %v3382_v35  ;;  %v2833_v24 = vpop.eup %2832 }
 0x21b   : > { %v1189_v2 = vmul.f32 %v2833_v24, %v3377_v38 }
 0x21c   : > { %v1210_v10 = vmul.f32 %v3518_v21, %v1188_v15 }
 0x21d   : > { %v1211_v12 = vmul.f32 %v3518_v21, %v1189_v2 }
 0x21e   : > { %v2835_v4 = vpop.eup %2834  ;;  %v3540_v38 = vadd.f32 %v3537_v18, %v1210_v10 }
 0x21f   : > { %v1190_v44 = vmul.f32 %v2835_v4, %v3394_v61  ;;  %v2837_v60 = vpop.eup %2836  ;;  %v3548_v30 = vadd.f32 %v3537_v18, %v1211_v12 }
 0x220   : > { %v1191_v11 = vmul.f32 %v2837_v60, %v3386_v52 }
 0x221   : > { %v1212_v48 = vmul.f32 %v3518_v21, %v1190_v44 }
 0x222   : > { %v1213_v50 = vmul.f32 %v3518_v21, %v1191_v11 }
 0x223   : > { %v3556_v61 = vadd.f32 %v3537_v18, %v1212_v48 }
 0x224   : > { %v3564_v52 = vadd.f32 %v3537_v18, %v1213_v50 }
 0x23c   : > { %v1106_v47 = vpop.xlane.xlu0 %1105 }
 0x23d   : > { %v1144_v28 = vmul.f32 0.0625, %v1106_v47 }
 0x23f   : > { %v1160_v53 = vadd.f32 1e-06, %v1144_v28 }
 0x241   : > { %v1109_v58 = vpop.xlane.xlu1 %1108  ;;  %2838 = vrsqrt.f32 %v1160_v53 }
 0x242   : > { %v1145_v27 = vmul.f32 0.0625, %v1109_v58 }
 0x244   : > { %v713_v5 = vpop.permute.xlu0 %712  ;;  %v1161_v26 = vadd.f32 1e-06, %v1145_v27 }
 0x245   : > { %v1112_v8 = vpop.xlane.xlu1 %1111  ;;  %v777_v31 = vadd.f32 %v773_v63, %v713_v5  ;;  %v3506_v9 = vadd.f32 %v772_v62, %v713_v5  ;;  %v3528_v37 = vadd.f32 %v713_v5, %v706_v1  ;;  %v3530_v36 = vadd.f32 %v713_v5, %v707_v40 }
 0x246   : > { %v1146_v22 = vmul.f32 0.0625, %v1112_v8  ;;  %2840 = vrsqrt.f32 %v1161_v26 }
 0x247   : > { %1809 = vmatprep.mubr.f32.mxu1 %v777_v31 }
 0x248   : > { %v1258_v6 = vpop.permute.xlu0 %1257  ;;  %v1162_v33 = vadd.f32 1e-06, %v1146_v22 }
 0x249   : > { %v1262_v29 = vmul.f32 %v1258_v6, %v3510_v17  ;;  %v1263_v35 = vmul.f32 %v1258_v6, %v3513_v25  ;;  %v1118_v63 = vpop.xlane.xlu1 %1117 }
 0x24a   : > { %2842 = vrsqrt.f32 %v1162_v33  ;;  %v1148_v62 = vmul.f32 0.0625, %v1118_v63 }
 0x24b   : > { %1340 = vmatprep.subr.mxu0 %v1263_v35 }
 0x24c   : > { %1341 = vmatpush1.msra.mxu0 %v1262_v29  ;;  %v1253_v41 = vpop.permute.xlu0 %1252  ;;  %v1164_v8 = vadd.f32 1e-06, %v1148_v62 }
 0x24d   : > { %v1260_v16 = vmul.f32 %v1253_v41, %v3528_v37  ;;  %v1261_v14 = vmul.f32 %v1253_v41, %v3530_v36 }
 0x24e   : > { %v2839_v49 = vpop.eup %2838  ;;  %2844 = vrsqrt.f32 %v1164_v8 }
 0x24f   : > { %1342 = vmatprep.subr.mxu0 %v1261_v14  ;;  %v1192_v51 = vmul.f32 %v2839_v49, %v3416_v13 }
 0x250   : > { %1343 = vmatpush1.msra.mxu0 %v1260_v16 }
 0x251   : > { %2680 = vmatmul.mubr.msk.f32.vlgmr.msra.gmra.mxu0 %vm995_vm2, %v3540_v38  ;;  %v1214_v54 = vmul.f32 %v3518_v21, %v1192_v51 }
 0x252   : > { %1382 = vmatprep.mubr.f32.mxu0 %v4359_v0 }
 0x253   : > { %v2841_v42 = vpop.eup %2840  ;;  %v3572_v13 = vadd.f32 %v3537_v18, %v1214_v54 }
 0x254   : > { %v1193_v47 = vmul.f32 %v2841_v42, %v3422_v7 }
 0x255   : > { %2681 = vmatmul.mubr.msk.f32.gmra.mxu0 %vm995_vm2, %v3548_v30 }
 0x256   : > { %1388 = vmatprep.mubr.f32.mxu0 %v4359_v0  ;;  %v1215_v28 = vmul.f32 %v3518_v21, %v1193_v47 }
 0x257   : > { %v2843_v55 = vpop.eup %2842 }
 0x258   : > { %v1194_v58 = vmul.f32 %v2843_v55, %v3425_v23  ;;  %v3580_v7 = vadd.f32 %v3537_v18, %v1215_v28  ;;  %v1121_v23 = vpop.xlane.xlu1 %1120 }
 0x259   : > { %2682 = vmatmul.mubr.msk.f32.gmra.mxu0 %vm995_vm2, %v3556_v61  ;;  %v1149_v31 = vmul.f32 0.0625, %v1121_v23 }
 0x25a   : > { %1394 = vmatprep.mubr.f32.mxu0 %v4359_v0  ;;  %v1216_v57 = vmul.f32 %v3518_v21, %v1194_v58 }
 0x25b   : > { %v1165_v26 = vadd.f32 1e-06, %v1149_v31  ;;  %v2845_v4 = vpop.eup %2844 }
 0x25c   : > { %v3587_v53 = vadd.f32 %v3537_v18, %v1216_v57  ;;  %v1124_v27 = vpop.xlane.xlu1 %1123  ;;  %v1196_v12 = vmul.f32 %v2845_v4, %v3430_v34 }
 0x25d   : > { %2683 = vmatmul.mubr.msk.f32.gmra.mxu0 %vm995_vm2, %v3564_v52  ;;  %v1150_v6 = vmul.f32 0.0625, %v1124_v27 }
 0x25e   : > { %1400 = vmatprep.mubr.f32.mxu0 %v4359_v0  ;;  %v1218_v51 = vmul.f32 %v3518_v21, %v1196_v12 }
 0x25f   : > { %v1166_v35 = vadd.f32 1e-06, %v1150_v6 }
 0x260   : > { %v1127_v5 = vpop.xlane.xlu1 %1126 }
 0x261   : > { %2684 = vmatmul.mubr.msk.f32.gmra.mxu0 %vm995_vm2, %v3572_v13  ;;  %v1151_v1 = vmul.f32 0.0625, %v1127_v5 }
 0x262   : > { %1406 = vmatprep.mubr.f32.mxu0 %v4359_v0 }
 0x263   : > { %v1167_v10 = vadd.f32 1e-06, %v1151_v1 }
 0x264   : > { %v1130_v22 = vpop.xlane.xlu1 %1129 }
 0x265   : > { %2685 = vmatmul.mubr.msk.f32.gmra.mxu0 %vm995_vm2, %v3580_v7  ;;  %v1152_v2 = vmul.f32 0.0625, %v1130_v22 }
 0x266   : > { %1412 = vmatprep.mubr.f32.mxu0 %v4359_v0 }
 0x267   : > { %v1168_v41 = vadd.f32 1e-06, %v1152_v2 }
 0x268   : > { %v1133_v40 = vpop.xlane.xlu1 %1132 }
 0x269   : > { %2686 = vmatmul.mubr.msk.f32.gmra.mxu0 %vm995_vm2, %v3587_v53  ;;  %v1153_v16 = vmul.f32 0.0625, %v1133_v40 }
 0x26a   : > { %1418 = vmatprep.mubr.f32.mxu0 %v4359_v0 }
 0x26b   : > { %v1169_v60 = vadd.f32 1e-06, %v1153_v16 }
 0x26c   : > { %v1136_v33 = vpop.xlane.xlu1 %1135 }
 0x26d   : > { %v1154_v48 = vmul.f32 0.0625, %v1136_v33 }
 0x26f   : > { %v1170_v54 = vadd.f32 1e-06, %v1154_v48 }
 0x270   : > { %v1139_v49 = vpop.xlane.xlu1 %1138 }
 0x271   : > { %v1155_v47 = vmul.f32 0.0625, %v1139_v49 }
 0x273   : > { %v1171_v28 = vadd.f32 1e-06, %v1155_v47 }
 0x279   : > { %v1115_v15 = vpop.xlane.xlu0 %1114 }
 0x27a   : > { %v1147_v24 = vmul.f32 0.0625, %v1115_v15 }
 0x27c   : > { %v1163_v29 = vadd.f32 1e-06, %v1147_v24 }
 0x27e   : > { %2846 = vrsqrt.f32 %v1163_v29 }
 0x27f   : > { %2848 = vrsqrt.f32 %v1165_v26 }
 0x280   : > { %2850 = vrsqrt.f32 %v1166_v35 }
 0x281   : > { %2852 = vrsqrt.f32 %v1167_v10 }
 0x282   : > { %2854 = vrsqrt.f32 %v1168_v41 }
 0x283   : > { %2856 = vrsqrt.f32 %v1169_v60 }
 0x284   : > { %2858 = vrsqrt.f32 %v1170_v54 }
 0x285   : > { %2860 = vrsqrt.f32 %v1171_v28 }
 0x28b   : > { %v2847_v14 = vpop.eup %2846 }
 0x28c   : > { %v2849_v44 = vpop.eup %2848  ;;  %v1195_v11 = vmul.f32 %v2847_v14, %v3491_v39  ;;  %v3604_v39 = vadd.f32 %v3537_v18, %v1218_v51 }
 0x28d   : > { %v1197_v42 = vmul.f32 %v2849_v44, %v3436_v43  ;;  %v2851_v34 = vpop.eup %2850 }
 0x28e   : > { %v1217_v50 = vmul.f32 %v3518_v21, %v1195_v11  ;;  %v1198_v43 = vmul.f32 %v2851_v34, %v3442_v46  ;;  %v2853_v63 = vpop.eup %2852 }
 0x28f   : > { %v1219_v58 = vmul.f32 %v3518_v21, %v1197_v42  ;;  %v1199_v27 = vmul.f32 %v2853_v63, %v3448_v19  ;;  %v2855_v62 = vpop.eup %2854 }
 0x290   : > { %v3598_v55 = vadd.f32 %v3537_v18, %v1217_v50  ;;  %v1220_v23 = vmul.f32 %v3518_v21, %v1198_v43  ;;  %v1200_v8 = vmul.f32 %v2855_v62, %v3457_v56  ;;  %v2857_v31 = vpop.eup %2856 }
 0x291   : > { %v3612_v57 = vadd.f32 %v3537_v18, %v1219_v58  ;;  %v1221_v5 = vmul.f32 %v3518_v21, %v1199_v27  ;;  %v1201_v24 = vmul.f32 %v2857_v31, %v3466_v3  ;;  %v2859_v26 = vpop.eup %2858 }
 0x292   : > { %2687 = vmatmul.mubr.msk.f32.gmra.mxu0 %vm995_vm2, %v3598_v55  ;;  %v3620_v46 = vadd.f32 %v3537_v18, %v1220_v23  ;;  %v1222_v15 = vmul.f32 %v3518_v21, %v1200_v8  ;;  %v1202_v6 = vmul.f32 %v2859_v26, %v3475_v20  ;;  %v2861_v29 = vpop.eup %2860 }
 0x293   : > { %1424 = vmatprep.mubr.f32.mxu0 %v4359_v0  ;;  %v3628_v19 = vadd.f32 %v3537_v18, %v1221_v5  ;;  %v1223_v22 = vmul.f32 %v3518_v21, %v1201_v24  ;;  %v1203_v1 = vmul.f32 %v2861_v29, %v3481_v59 }
 0x294   : > { %v3636_v56 = vadd.f32 %v3537_v18, %v1222_v15  ;;  %v1224_v35 = vmul.f32 %v3518_v21, %v1202_v6 }
 0x295   : > { %v3644_v3 = vadd.f32 %v3537_v18, %v1223_v22  ;;  %v1225_v40 = vmul.f32 %v3518_v21, %v1203_v1 }
 0x296   : > { %2688 = vmatmul.mubr.msk.f32.gmra.mxu0 %vm995_vm2, %v3604_v39  ;;  %4366 = vst [vmem:[#allocation3_spill] sm:$0xff] %v3636_v56  ;;  %v3652_v20 = vadd.f32 %v3537_v18, %v1224_v35 }
 0x297   : > { %1430 = vmatprep.mubr.f32.mxu0 %v4359_v0  ;;  %4367 = vst [vmem:[#allocation4_spill] sm:$0xff] %v3644_v3  ;;  %v3659_v10 = vadd.f32 %v3537_v18, %v1225_v40 }
 0x298   : > { %4368 = vst [vmem:[#allocation5_spill] sm:$0xff] %v3652_v20 }
 0x299   : > { %4369 = vst [vmem:[#allocation6_spill] sm:$0xff] %v3659_v10 }
 0x29a   : > { %2689 = vmatmul.mubr.msk.f32.gmra.mxu0 %vm995_vm2, %v3612_v57 }
 0x29b   : > { %1436 = vmatprep.mubr.f32.mxu0 %v4359_v0 }
 0x29e   : > { %2690 = vmatmul.mubr.msk.f32.gmra.mxu0 %vm995_vm2, %v3620_v46 }
 0x29f   : > { %1442 = vmatprep.mubr.f32.mxu0 %v4359_v0 }
 0x2a2   : > { %2691 = vmatmul.mubr.msk.f32.gmra.mxu0 %vm995_vm2, %v3628_v19 }
 0x2a3   : > { %1448 = vmatprep.mubr.f32.mxu0 %v4359_v0 }
 0x2a6   : > { %2692 = vmatmul.mubr.msk.f32.gmra.mxu0 %vm995_vm2, %v3636_v56 }
 0x2a7   : > { %1454 = vmatprep.mubr.f32.mxu0 %v4359_v0 }
 0x2aa   : > { %2693 = vmatmul.mubr.msk.f32.gmra.mxu0 %vm995_vm2, %v3644_v3 }
 0x2ab   : > { %1460 = vmatprep.mubr.f32.mxu0 %v4359_v0 }
 0x2ae   : > { %2694 = vmatmul.mubr.msk.f32.gmra.mxu0 %vm995_vm2, %v3652_v20 }
 0x2af   : > { %1466 = vmatprep.mubr.f32.mxu0 %v4359_v0 }
 0x2b2   : > { %2695 = vmatmul.mubr.msk.f32.gmra.mxu0 %vm995_vm2, %v3659_v10 }
 0x2b3   : > { %2330 = vmatprep.mubr.f32.mxu0 %v3500_v32 }
 0x311   : > { %v3664_v59 = vpop.f32.mrf.mxu0 }
 0x313   : > { %v3666_v2 = vpop.f32.mrf.mxu0 }
 0x315   : > { %v3668_v33 = vpop.f32.mrf.mxu0 }
 0x317   : > { %v3670_v21 = vpop.f32.mrf.mxu0 }
 0x319   : > { %v3672_v4 = vpop.f32.mrf.mxu0 }
 0x31b   : > { %v3674_v41 = vpop.f32.mrf.mxu0 }
 0x31d   : > { %v3676_v16 = vpop.f32.mrf.mxu0 }
 0x31f   : > { %v3678_v18 = vpop.f32.mrf.mxu0 }
 0x321   : > { %v1402_v14 = vpop.f32.mrf.mxu0 }
 0x323   : > { %v1404_v12 = vpop.f32.mrf.mxu0 }
 0x325   : > { %v3680_v44 = vpop.f32.mrf.mxu0 }
 0x327   : > { %v1410_v32 = vpop.f32.mrf.mxu0 }
 0x329   : > { %v1414_v60 = vpop.f32.mrf.mxu0 }
 0x32b   : > { %v1416_v48 = vpop.f32.mrf.mxu0 }
 0x352   : > { %v1420_v11 = vpop.f32.mrf.mxu0 }
 0x354   : > { %v1422_v49 = vpop.f32.mrf.mxu0 }
 0x356   : > { %v1426_v50 = vpop.f32.mrf.mxu0 }
 0x358   : > { %v1428_v51 = vpop.f32.mrf.mxu0 }
 0x35a   : > { %v1432_v42 = vpop.f32.mrf.mxu0 }
 0x35c   : > { %v1434_v54 = vpop.f32.mrf.mxu0 }
 0x35e   : > { %v1438_v47 = vpop.f32.mrf.mxu0 }
 0x360   : > { %v1440_v34 = vpop.f32.mrf.mxu0 }
 0x361   : > { %v3696_v1 = vmul.f32 0.35355338, %v1440_v34 }
 0x362   : > { %v1444_v28 = vpop.f32.mrf.mxu0 }
 0x364   : > { %v1446_v58 = vpop.f32.mrf.mxu0 }
 0x366   : > { %v1450_v43 = vpop.f32.mrf.mxu0 }
 0x367   : > { %v3690_v6 = vmul.f32 0.35355338, %v1450_v43  ;;  %v3708_v43 = vmul.f32 0.35355338, %v1428_v51 }
 0x368   : > { %v1452_v63 = vpop.f32.mrf.mxu0 }
 0x369   : > { %v3686_v24 = vmul.f32 0.35355338, %v1452_v63 }
 0x36a   : > { %v1456_v23 = vpop.f32.mrf.mxu0 }
 0x36b   : > { %v3706_v0 = vmul.f32 0.35355338, %v1456_v23  ;;  %v3722_v23 = vmul.f32 0.35355338, %v1434_v54 }
 0x36c   : > { %v1458_v27 = vpop.f32.mrf.mxu0 }
 0x36d   : > { %v3698_v40 = vmul.f32 0.35355338, %v1458_v27 }
 0x36e   : > { %v1462_v62 = vpop.f32.mrf.mxu0 }
 0x36f   : > { %v3682_v8 = vmul.f32 0.35355338, %v1462_v62  ;;  %v1541_v62 = vmax.f32 %v3690_v6, %v3686_v24  ;;  %v1544_v27 = vmax.f32 %v3706_v0, %v3698_v40 }
 0x370   : > { %v1464_v5 = vpop.f32.mrf.mxu0 }
 0x371   : > { %v3684_v31 = vmul.f32 0.35355338, %v1464_v5  ;;  %v3704_v5 = vmul.f32 0.35355338, %v1438_v47  ;;  %v3720_v47 = vmul.f32 0.35355338, %v1416_v48 }
 0x372   : > { %v1468_v15 = vpop.f32.mrf.mxu0 }
 0x373   : > { %v1547_v26 = vmax.f32 %v3682_v8, %v3684_v31  ;;  %v3692_v29 = vmul.f32 0.35355338, %v1468_v15  ;;  %v3710_v15 = vmul.f32 0.35355338, %v1446_v58  ;;  %v1535_v34 = vmax.f32 %v3704_v5, %v3696_v1 }
 0x374   : > { %v1470_v22 = vpop.f32.mrf.mxu0 }
 0x375   : > { %v3694_v35 = vmul.f32 0.35355338, %v1470_v22  ;;  %1548 = vmax.xlane.f32.xlu1 %v1547_v26  ;;  %v3716_v26 = vmul.f32 0.35355338, %v1426_v50  ;;  %v3718_v22 = vmul.f32 0.35355338, %v1444_v28 }
 0x376   : > { %v3732_v50 = vmul.f32 0.35355338, %v1404_v12  ;;  %v3734_v28 = vmul.f32 0.35355338, %v1422_v49 }
 0x377   : > { %v1550_v63 = vmax.f32 %v3692_v29, %v3694_v35  ;;  %v1529_v51 = vmax.f32 %v3716_v26, %v3708_v43  ;;  %v1538_v58 = vmax.f32 %v3718_v22, %v3710_v15 }
 0x379   : > { %1542 = vmax.xlane.f32.xlu1 %v1541_v62  ;;  %1551 = vmax.xlane.f32.xlu0 %v1550_v63  ;;  %v3728_v62 = vmul.f32 0.35355338, %v1414_v60  ;;  %v3730_v63 = vmul.f32 0.35355338, %v1432_v42  ;;  %v3745_v60 = vmul.f32 0.35355338, %v3674_v41 }
 0x37a   : > { %v3747_v42 = vmul.f32 0.35355338, %v1410_v32  ;;  %v3763_v41 = vmul.f32 0.35355338, %v3678_v18 }
 0x37b   : > { %v1523_v48 = vmax.f32 %v3728_v62, %v3720_v47  ;;  %v1532_v54 = vmax.f32 %v3730_v63, %v3722_v23 }
 0x37d   : > { %1536 = vmax.xlane.f32.xlu1 %v1535_v34  ;;  %1545 = vmax.xlane.f32.xlu0 %v1544_v27  ;;  %v3740_v34 = vmul.f32 0.35355338, %v1402_v14  ;;  %v3742_v27 = vmul.f32 0.35355338, %v1420_v11  ;;  %v3757_v14 = vmul.f32 0.35355338, %v3680_v44 }
 0x37e   : > { %v3760_v11 = vmul.f32 0.35355338, %v3666_v2  ;;  %v3773_v44 = vmul.f32 0.35355338, %v3676_v16  ;;  %v3776_v2 = vmul.f32 0.35355338, %v3670_v21 }
 0x37f   : > { %v1517_v12 = vmax.f32 %v3740_v34, %v3732_v50  ;;  %v1526_v49 = vmax.f32 %v3742_v27, %v3734_v28 }
 0x381   : > { %1530 = vmax.xlane.f32.xlu1 %v1529_v51  ;;  %1539 = vmax.xlane.f32.xlu0 %v1538_v58  ;;  %v3754_v51 = vmul.f32 0.35355338, %v3672_v4  ;;  %v1520_v58 = vmax.f32 %v3757_v14, %v3747_v42  ;;  %v3770_v4 = vmul.f32 0.35355338, %v3664_v59 }
 0x383   : > { %v1511_v32 = vmax.f32 %v3754_v51, %v3745_v60  ;;  %v1505_v18 = vmax.f32 %v3770_v4, %v3760_v11 }
 0x385   : > { %1524 = vmax.xlane.f32.xlu1 %v1523_v48  ;;  %1533 = vmax.xlane.f32.xlu0 %v1532_v54  ;;  %v1514_v48 = vmax.f32 %v3773_v44, %v3763_v41  ;;  %v3783_v54 = vmul.f32 0.35355338, %v3668_v33 }
 0x387   : > { %v1508_v59 = vmax.f32 %v3783_v54, %v3776_v2 }
 0x389   : > { %1518 = vmax.xlane.f32.xlu1 %v1517_v12  ;;  %1527 = vmax.xlane.f32.xlu0 %v1526_v49 }
 0x38d   : > { %1512 = vmax.xlane.f32.xlu1 %v1511_v32  ;;  %1521 = vmax.xlane.f32.xlu0 %v1520_v58 }
 0x391   : > { %1506 = vmax.xlane.f32.xlu1 %v1505_v18  ;;  %1515 = vmax.xlane.f32.xlu0 %v1514_v48 }
 0x395   : > { %1509 = vmax.xlane.f32.xlu0 %v1508_v59 }
 0x3fe   : > { %v1549_v16 = vpop.xlane.xlu1 %1548 }
 0x3ff   : > { %v1581_v12 = vsub.f32 %v3682_v8, %v1549_v16  ;;  %v1582_v21 = vsub.f32 %v3684_v31, %v1549_v16 }
 0x401   : > { %v1641_v49 = vmul.f32 1.442695, %v1581_v12  ;;  %v1643_v32 = vmul.f32 1.442695, %v1582_v21 }
 0x402   : > { %v1543_v58 = vpop.xlane.xlu1 %1542  ;;  %v1552_v45 = vpop.xlane.xlu0 %1551 }
 0x403   : > { %2862 = vpow2.f32 %v1641_v49  ;;  %v1577_v10 = vsub.f32 %v3690_v6, %v1543_v58  ;;  %v1578_v33 = vsub.f32 %v3686_v24, %v1543_v58  ;;  %v1583_v18 = vsub.f32 %v3692_v29, %v1552_v45 }
 0x404   : > { %2864 = vpow2.f32 %v1643_v32  ;;  %v1584_v48 = vsub.f32 %v3694_v35, %v1552_v45 }
 0x405   : > { %v1633_v59 = vmul.f32 1.442695, %v1577_v10  ;;  %v1635_v20 = vmul.f32 1.442695, %v1578_v33  ;;  %v1645_v3 = vmul.f32 1.442695, %v1583_v18 }
 0x406   : > { %v1647_v8 = vmul.f32 1.442695, %v1584_v48  ;;  %v1537_v56 = vpop.xlane.xlu1 %1536  ;;  %v1546_v31 = vpop.xlane.xlu0 %1545 }
 0x407   : > { %2866 = vpow2.f32 %v1633_v59  ;;  %v1573_v16 = vsub.f32 %v3704_v5, %v1537_v56  ;;  %v1574_v12 = vsub.f32 %v3696_v1, %v1537_v56  ;;  %v1579_v6 = vsub.f32 %v3706_v0, %v1546_v31 }
 0x408   : > { %2868 = vpow2.f32 %v1635_v20  ;;  %v1580_v24 = vsub.f32 %v3698_v40, %v1546_v31 }
 0x409   : > { %2870 = vpow2.f32 %v1645_v3  ;;  %v1625_v29 = vmul.f32 1.442695, %v1573_v16  ;;  %v1627_v21 = vmul.f32 1.442695, %v1574_v12  ;;  %v1637_v45 = vmul.f32 1.442695, %v1579_v6 }
 0x40a   : > { %2872 = vpow2.f32 %v1647_v8  ;;  %v1639_v10 = vmul.f32 1.442695, %v1580_v24  ;;  %v1531_v35 = vpop.xlane.xlu1 %1530  ;;  %v1540_v49 = vpop.xlane.xlu0 %1539 }
 0x40b   : > { %2874 = vpow2.f32 %v1625_v29  ;;  %v1569_v32 = vsub.f32 %v3716_v26, %v1531_v35  ;;  %v1570_v5 = vsub.f32 %v3708_v43, %v1531_v35  ;;  %v1575_v56 = vsub.f32 %v3718_v22, %v1540_v49 }
 0x40c   : > { %2876 = vpow2.f32 %v1627_v21  ;;  %v1576_v0 = vsub.f32 %v3710_v15, %v1540_v49 }
 0x40d   : > { %2878 = vpow2.f32 %v1637_v45  ;;  %v1617_v20 = vmul.f32 1.442695, %v1569_v32  ;;  %v1619_v3 = vmul.f32 1.442695, %v1570_v5  ;;  %v1629_v1 = vmul.f32 1.442695, %v1575_v56 }
 0x40e   : > { %2880 = vpow2.f32 %v1639_v10  ;;  %v1631_v40 = vmul.f32 1.442695, %v1576_v0  ;;  %v1525_v58 = vpop.xlane.xlu1 %1524  ;;  %v1534_v33 = vpop.xlane.xlu0 %1533 }
 0x40f   : > { %2882 = vpow2.f32 %v1617_v20  ;;  %v1565_v18 = vsub.f32 %v3728_v62, %v1525_v58  ;;  %v1566_v26 = vsub.f32 %v3720_v47, %v1525_v58  ;;  %v1571_v43 = vsub.f32 %v3730_v63, %v1534_v33 }
 0x410   : > { %v3804_v48 = vpop.eup %2862  ;;  %2884 = vpow2.f32 %v1619_v3  ;;  %v1572_v15 = vsub.f32 %v3722_v23, %v1534_v33 }
 0x411   : > { %v3807_v22 = vpop.eup %2864  ;;  %2886 = vpow2.f32 %v1629_v1  ;;  %v1609_v59 = vmul.f32 1.442695, %v1565_v18  ;;  %v1611_v8 = vmul.f32 1.442695, %v1566_v26  ;;  %v1621_v31 = vmul.f32 1.442695, %v1571_v43 }
 0x412   : > { %2888 = vpow2.f32 %v1631_v40  ;;  %v1623_v16 = vmul.f32 1.442695, %v1572_v15  ;;  %v1519_v12 = vpop.xlane.xlu1 %1518  ;;  %v1528_v6 = vpop.xlane.xlu0 %1527  ;;  %v1691_v47 = vadd.f32 %v3807_v22, %v3804_v48 }
 0x413   : > { %2890 = vpow2.f32 %v1609_v59  ;;  %v1561_v62 = vsub.f32 %v3740_v34, %v1519_v12  ;;  %v1562_v63 = vsub.f32 %v3732_v50, %v1519_v12  ;;  %v1567_v23 = vsub.f32 %v3742_v27, %v1528_v6 }
 0x414   : > { %v3814_v24 = vpop.eup %2866  ;;  %2892 = vpow2.f32 %v1611_v8  ;;  %v1568_v29 = vsub.f32 %v3734_v28, %v1528_v6  ;;  %1692 = vadd.xlane.f32.xlu1 %v1691_v47 }
 0x415   : > { %v3817_v21 = vpop.eup %2868  ;;  %2894 = vpow2.f32 %v1621_v31  ;;  %v1601_v45 = vmul.f32 1.442695, %v1561_v62  ;;  %v1603_v10 = vmul.f32 1.442695, %v1562_v63  ;;  %v1613_v35 = vmul.f32 1.442695, %v1567_v23 }
 0x416   : > { %v3819_v49 = vpop.eup %2870  ;;  %2896 = vpow2.f32 %v1623_v16  ;;  %v1615_v34 = vmul.f32 1.442695, %v1568_v29  ;;  %v1513_v32 = vpop.xlane.xlu1 %1512  ;;  %v1685_v27 = vadd.f32 %v3817_v21, %v3814_v24 }
 0x417   : > { %v1522_v50 = vpop.xlane.xlu0 %1521  ;;  %v3823_v5 = vpop.eup %2872  ;;  %2898 = vpow2.f32 %v1601_v45  ;;  %v1557_v28 = vsub.f32 %v3754_v51, %v1513_v32  ;;  %v1558_v56 = vsub.f32 %v3745_v60, %v1513_v32 }
 0x418   : > { %v1563_v0 = vsub.f32 %v3757_v14, %v1522_v50  ;;  %v3828_v20 = vpop.eup %2874  ;;  %2900 = vpow2.f32 %v1603_v10  ;;  %v1564_v3 = vsub.f32 %v3747_v42, %v1522_v50  ;;  %1686 = vadd.xlane.f32.xlu1 %v1685_v27  ;;  %v1694_v1 = vadd.f32 %v3823_v5, %v3819_v49 }
 0x419   : > { %v3833_v40 = vpop.eup %2876  ;;  %2902 = vpow2.f32 %v1613_v35  ;;  %v1593_v58 = vmul.f32 1.442695, %v1557_v28  ;;  %v1595_v33 = vmul.f32 1.442695, %v1558_v56 }
 0x41a   : > { %v1605_v18 = vmul.f32 1.442695, %v1563_v0  ;;  %v3835_v51 = vpop.eup %2878  ;;  %2904 = vpow2.f32 %v1615_v34  ;;  %v1607_v60 = vmul.f32 1.442695, %v1564_v3  ;;  %1695 = vadd.xlane.f32.xlu0 %v1694_v1  ;;  %v1507_v14 = vpop.xlane.xlu1 %1506  ;;  %v1679_v42 = vadd.f32 %v3833_v40, %v3828_v20 }
 0x41b   : > { %v1516_v26 = vpop.xlane.xlu0 %1515  ;;  %v3839_v43 = vpop.eup %2880  ;;  %2906 = vpow2.f32 %v1593_v58  ;;  %v1553_v15 = vsub.f32 %v3770_v4, %v1507_v14  ;;  %v1554_v59 = vsub.f32 %v3760_v11, %v1507_v14 }
 0x41c   : > { %v1559_v8 = vsub.f32 %v3773_v44, %v1516_v26  ;;  %v3844_v31 = vpop.eup %2882  ;;  %2908 = vpow2.f32 %v1595_v33  ;;  %v1560_v16 = vsub.f32 %v3763_v41, %v1516_v26  ;;  %1680 = vadd.xlane.f32.xlu1 %v1679_v42  ;;  %v1688_v12 = vadd.f32 %v3839_v43, %v3835_v51 }
 0x41d   : > { %v3849_v6 = vpop.eup %2884  ;;  %2910 = vpow2.f32 %v1605_v18  ;;  %v1585_v47 = vmul.f32 1.442695, %v1553_v15  ;;  %v1587_v62 = vmul.f32 1.442695, %v1554_v59 }
 0x41e   : > { %v1597_v63 = vmul.f32 1.442695, %v1559_v8  ;;  %v3851_v4 = vpop.eup %2886  ;;  %2912 = vpow2.f32 %v1607_v60  ;;  %v1599_v11 = vmul.f32 1.442695, %v1560_v16  ;;  %1689 = vadd.xlane.f32.xlu0 %v1688_v12  ;;  %v1673_v23 = vadd.f32 %v3849_v6, %v3844_v31 }
 0x41f   : > { %v1510_v44 = vpop.xlane.xlu0 %1509  ;;  %v3855_v41 = vpop.eup %2888  ;;  %2914 = vpow2.f32 %v1585_v47 }
 0x420   : > { %v1555_v29 = vsub.f32 %v3783_v54, %v1510_v44  ;;  %v1556_v45 = vsub.f32 %v3776_v2, %v1510_v44  ;;  %v3859_v10 = vpop.eup %2890  ;;  %2916 = vpow2.f32 %v1587_v62  ;;  %1674 = vadd.xlane.f32.xlu1 %v1673_v23  ;;  %v1682_v35 = vadd.f32 %v3855_v41, %v3851_v4  ;;  %v2696_v23 = vld [vmem:[%s4351_s6 + $0x10] sm:$0xff] }
 0x421   : > { %v3863_v34 = vpop.eup %2892  ;;  %2918 = vpow2.f32 %v1597_v63 }
 0x422   : > { %v1589_v32 = vmul.f32 1.442695, %v1555_v29  ;;  %v1591_v50 = vmul.f32 1.442695, %v1556_v45  ;;  %v3865_v27 = vpop.eup %2894  ;;  %2920 = vpow2.f32 %v1599_v11  ;;  %1683 = vadd.xlane.f32.xlu0 %v1682_v35  ;;  %v1667_v54 = vadd.f32 %v3863_v34, %v3859_v10  ;;  %v2697_v29 = vld [vmem:[%s4351_s6 + $0x18] sm:$0xff] }
 0x423   : > { %v3869_v2 = vpop.eup %2896 }
 0x424   : > { %2922 = vpow2.f32 %v1589_v32  ;;  %v3871_v28 = vpop.eup %2898  ;;  %1668 = vadd.xlane.f32.xlu1 %v1667_v54  ;;  %v1676_v56 = vadd.f32 %v3869_v2, %v3865_v27 }
 0x425   : > { %2924 = vpow2.f32 %v1591_v50  ;;  %v3875_v0 = vpop.eup %2900 }
 0x426   : > { %v3877_v3 = vpop.eup %2902  ;;  %1677 = vadd.xlane.f32.xlu0 %v1676_v56  ;;  %v1661_v1 = vadd.f32 %v3875_v0, %v3871_v28 }
 0x427   : > { %v3881_v58 = vpop.eup %2904 }
 0x428   : > { %v3883_v33 = vpop.eup %2906  ;;  %1662 = vadd.xlane.f32.xlu1 %v1661_v1  ;;  %v1670_v18 = vadd.f32 %v3881_v58, %v3877_v3 }
 0x429   : > { %v3887_v60 = vpop.eup %2908 }
 0x42a   : > { %v3889_v14 = vpop.eup %2910  ;;  %1671 = vadd.xlane.f32.xlu0 %v1670_v18  ;;  %v1655_v26 = vadd.f32 %v3887_v60, %v3883_v33 }
 0x42b   : > { %v3893_v42 = vpop.eup %2912 }
 0x42c   : > { %v3895_v15 = vpop.eup %2914  ;;  %1656 = vadd.xlane.f32.xlu1 %v1655_v26  ;;  %v1664_v59 = vadd.f32 %v3893_v42, %v3889_v14 }
 0x42d   : > { %v3899_v8 = vpop.eup %2916 }
 0x42e   : > { %v3901_v16 = vpop.eup %2918  ;;  %1665 = vadd.xlane.f32.xlu0 %v1664_v59  ;;  %v1649_v12 = vadd.f32 %v3899_v8, %v3895_v15 }
 0x42f   : > { %v3905_v47 = vpop.eup %2920 }
 0x430   : > { %1650 = vadd.xlane.f32.xlu1 %v1649_v12  ;;  %v1658_v63 = vadd.f32 %v3905_v47, %v3901_v16 }
 0x431   : > { %v3907_v62 = vpop.eup %2922 }
 0x432   : > { %v3911_v11 = vpop.eup %2924  ;;  %1659 = vadd.xlane.f32.xlu0 %v1658_v63 }
 0x433   : > { %v1652_v44 = vadd.f32 %v3911_v11, %v3907_v62 }
 0x436   : > { %1653 = vadd.xlane.f32.xlu0 %v1652_v44 }
 0x441   : > { %1821 = vperm.xlu1 %2821, %v2696_v23  }
 0x44c   : > { %1826 = vperm.xlu0 %2820, %v2697_v29  }
 0x49d   : > { %v1693_v45 = vpop.xlane.xlu1 %1692 }
 0x49e   : > { %2926 = vrcp.f32 %v1693_v45 }
 0x4a1   : > { %v1687_v50 = vpop.xlane.xlu1 %1686 }
 0x4a3   : > { %v1696_v35 = vpop.xlane.xlu0 %1695 }
 0x4a4   : > { %2928 = vrcp.f32 %v1696_v35 }
 0x4a5   : > { %v1681_v18 = vpop.xlane.xlu1 %1680 }
 0x4a7   : > { %v1690_v32 = vpop.xlane.xlu0 %1689 }
 0x4a8   : > { %2930 = vrcp.f32 %v1690_v32 }
 0x4a9   : > { %2932 = vrcp.f32 %v1687_v50  ;;  %v1675_v35 = vpop.xlane.xlu1 %1674 }
 0x4ab   : > { %v1684_v54 = vpop.xlane.xlu0 %1683  ;;  %v2927_v56 = vpop.eup %2926 }
 0x4ac   : > { %2934 = vrcp.f32 %v1684_v54  ;;  %v1742_v12 = vmul.f32 %v2927_v56, %v3807_v22  ;;  %v1741_v23 = vmul.f32 %v2927_v56, %v3804_v48 }
 0x4ad   : > { %2936 = vrcp.f32 %v1681_v18 }
 0x4af   : > { %v1678_v44 = vpop.xlane.xlu0 %1677 }
 0x4b0   : > { %2938 = vrcp.f32 %v1678_v44 }
 0x4b1   : > { %v2929_v1 = vpop.eup %2928  ;;  %2940 = vrcp.f32 %v1675_v35 }
 0x4b2   : > { %v1744_v26 = vmul.f32 %v2929_v1, %v3823_v5  ;;  %v1743_v59 = vmul.f32 %v2929_v1, %v3819_v49 }
 0x4b3   : > { %v1672_v22 = vpop.xlane.xlu0 %1671 }
 0x4b4   : > { %1745 = vmatprep.subr.mxu1 %v1744_v26  ;;  %2942 = vrcp.f32 %v1672_v22 }
 0x4b5   : > { %v2931_v63 = vpop.eup %2930  ;;  %1746 = vmatpush1.xpose.msra.mxu1 %v1743_v59 }
 0x4b6   : > { %1747 = vmatprep.subr.mxu1 %v1742_v12  ;;  %v1740_v29 = vmul.f32 %v2931_v63, %v3839_v43  ;;  %v2933_v45 = vpop.eup %2932  ;;  %v1739_v5 = vmul.f32 %v2931_v63, %v3835_v51  ;;  %v1669_v43 = vpop.xlane.xlu1 %1668 }
 0x4b7   : > { %v1738_v49 = vmul.f32 %v2933_v45, %v3817_v21  ;;  %v1737_v50 = vmul.f32 %v2933_v45, %v3814_v24  ;;  %2944 = vrcp.f32 %v1669_v43  ;;  %v1666_v21 = vpop.xlane.xlu0 %1665 }
 0x4b8   : > { %2946 = vrcp.f32 %v1666_v21 }
 0x4b9   : > { %1748 = vmatpush1.xpose.msra.mxu1 %v1741_v23  ;;  %v2935_v32 = vpop.eup %2934 }
 0x4ba   : > { %1749 = vmatprep.subr.mxu1 %v1740_v29  ;;  %v1736_v48 = vmul.f32 %v2935_v32, %v3855_v41  ;;  %v2937_v54 = vpop.eup %2936  ;;  %v1735_v56 = vmul.f32 %v2935_v32, %v3851_v4  ;;  %v1663_v41 = vpop.xlane.xlu1 %1662 }
 0x4bb   : > { %v1734_v51 = vmul.f32 %v2937_v54, %v3833_v40  ;;  %v1733_v18 = vmul.f32 %v2937_v54, %v3828_v20  ;;  %2948 = vrcp.f32 %v1663_v41  ;;  %v1660_v40 = vpop.xlane.xlu0 %1659 }
 0x4bc   : > { %2950 = vrcp.f32 %v1660_v40 }
 0x4bd   : > { %1750 = vmatpush1.xpose.msra.mxu1 %v1739_v5  ;;  %v2939_v1 = vpop.eup %2938 }
 0x4be   : > { %1751 = vmatprep.subr.mxu1 %v1738_v49  ;;  %v1732_v24 = vmul.f32 %v2939_v1, %v3869_v2  ;;  %v2941_v26 = vpop.eup %2940  ;;  %v1731_v59 = vmul.f32 %v2939_v1, %v3865_v27  ;;  %v1657_v2 = vpop.xlane.xlu1 %1656 }
 0x4bf   : > { %v1730_v4 = vmul.f32 %v2941_v26, %v3849_v6  ;;  %v1729_v63 = vmul.f32 %v2941_v26, %v3844_v31  ;;  %2952 = vrcp.f32 %v1657_v2  ;;  %v1654_v6 = vpop.xlane.xlu0 %1653 }
 0x4c0   : > { %2954 = vrcp.f32 %v1654_v6 }
 0x4c1   : > { %1752 = vmatpush1.xpose.msra.mxu1 %v1737_v50  ;;  %v2943_v12 = vpop.eup %2942 }
 0x4c2   : > { %1753 = vmatprep.subr.mxu1 %v1736_v48  ;;  %v1728_v20 = vmul.f32 %v2943_v12, %v3881_v58  ;;  %v1727_v23 = vmul.f32 %v2943_v12, %v3877_v3  ;;  %v1651_v58 = vpop.xlane.xlu1 %1650 }
 0x4c3   : > { %2956 = vrcp.f32 %v1651_v58 }
 0x4c4   : > { %v2945_v44 = vpop.eup %2944 }
 0x4c5   : > { %1754 = vmatpush1.xpose.msra.mxu1 %v1735_v56  ;;  %v1726_v27 = vmul.f32 %v2945_v44, %v3863_v34  ;;  %v2947_v29 = vpop.eup %2946  ;;  %v1725_v45 = vmul.f32 %v2945_v44, %v3859_v10 }
 0x4c6   : > { %1755 = vmatprep.subr.mxu1 %v1734_v51  ;;  %v1724_v31 = vmul.f32 %v2947_v29, %v3893_v42  ;;  %v1723_v5 = vmul.f32 %v2947_v29, %v3889_v14  ;;  %v1822_v43 = vpop.permute.xlu1 %1821 }
 0x4c7   : > { %v1827_v54 = vpop.permute.xlu0 %1826 }
 0x4c8   : > { %v2949_v35 = vpop.eup %2948 }
 0x4c9   : > { %1756 = vmatpush1.xpose.msra.mxu1 %v1733_v18  ;;  %v1722_v3 = vmul.f32 %v2949_v35, %v3875_v0  ;;  %v2951_v49 = vpop.eup %2950  ;;  %v1721_v34 = vmul.f32 %v2949_v35, %v3871_v28 }
 0x4ca   : > { %1757 = vmatprep.subr.mxu1 %v1732_v24  ;;  %v1720_v32 = vmul.f32 %v2951_v49, %v3905_v47  ;;  %v1719_v42 = vmul.f32 %v2951_v49, %v3901_v16 }
 0x4cc   : > { %v2953_v10 = vpop.eup %2952 }
 0x4cd   : > { %1758 = vmatpush1.xpose.msra.mxu1 %v1731_v59  ;;  %v1718_v22 = vmul.f32 %v2953_v10, %v3887_v60  ;;  %v2955_v50 = vpop.eup %2954  ;;  %v1717_v14 = vmul.f32 %v2953_v10, %v3883_v33  ;;  %v1832_v60 = vmul.f32 %v1827_v54, %v3513_v25  ;;  %v1831_v33 = vmul.f32 %v1827_v54, %v3510_v17  ;;  %v4372_v17 = vld [vmem:[#allocation4_spill] sm:$0xff]  ;;  %v4373_v25 = vld [vmem:[#allocation5_spill] sm:$0xff] }
 0x4ce   : > { %1759 = vmatprep.subr.mxu1 %v1730_v4  ;;  %v1716_v0 = vmul.f32 %v2955_v50, %v3911_v11  ;;  %v1715_v28 = vmul.f32 %v2955_v50, %v3907_v62  ;;  %v1830_v11 = vmul.f32 %v1822_v43, %v3530_v36  ;;  %v1829_v62 = vmul.f32 %v1822_v43, %v3528_v37  ;;  %v4374_v37 = vld [vmem:[#allocation6_spill] sm:$0xff] }
 0x4d0   : > { %v2957_v48 = vpop.eup %2956 }
 0x4d1   : > { %1760 = vmatpush1.xpose.msra.mxu1 %v1729_v63  ;;  %v1714_v47 = vmul.f32 %v2957_v48, %v3899_v8  ;;  %v1713_v16 = vmul.f32 %v2957_v48, %v3895_v15  ;;  %v4370_v8 = vmov 0.0  }
 0x4d2   : > { %1761 = vmatprep.subr.mxu1 %v1728_v20 }
 0x4d5   : > { %1762 = vmatpush1.xpose.msra.mxu1 %v1727_v23 }
 0x4d6   : > { %1763 = vmatprep.subr.mxu1 %v1726_v27 }
 0x4d9   : > { %1764 = vmatpush1.xpose.msra.mxu1 %v1725_v45 }
 0x4da   : > { %1765 = vmatprep.subr.mxu1 %v1724_v31 }
 0x4dd   : > { %1766 = vmatpush1.xpose.msra.mxu1 %v1723_v5 }
 0x4de   : > { %1767 = vmatprep.subr.mxu1 %v1722_v3 }
 0x4e1   : > { %1768 = vmatpush1.xpose.msra.mxu1 %v1721_v34 }
 0x4e2   : > { %1769 = vmatprep.subr.mxu1 %v1720_v32 }
 0x4e5   : > { %1770 = vmatpush1.xpose.msra.mxu1 %v1719_v42 }
 0x4e6   : > { %1771 = vmatprep.subr.mxu1 %v1718_v22 }
 0x4e9   : > { %1772 = vmatpush1.xpose.msra.mxu1 %v1717_v14 }
 0x4ea   : > { %1773 = vmatprep.subr.mxu1 %v1716_v0 }
 0x4ed   : > { %1774 = vmatpush1.xpose.msra.mxu1 %v1715_v28 }
 0x4ee   : > { %1775 = vmatprep.subr.mxu1 %v1714_v47 }
 0x4f1   : > { %1776 = vmatpush1.xpose.msra.mxu1 %v1713_v16 }
 0x4f2   : > { %1861 = vmatprep.subr.mxu1 %v1832_v60 }
 0x4f4   : > { %1810 = vmatmul.mubr.f32.vlgmr.msra.gmra.mxu1 %v3506_v9  ;;  %v4371_v9 = vld [vmem:[#allocation3_spill] sm:$0xff] }
 0x4f5   : > { %1862 = vmatpush1.msra.mxu1 %v1831_v33  ;;  %1897 = vmatprep.mubr.f32.mxu1 %v4370_v8 }
 0x4f6   : > { %1863 = vmatprep.subr.mxu1 %v1830_v11 }
 0x4f7   : > { %1864 = vmatpush1.msra.mxu1 %v1829_v62 }
 0x4f8   : > { %2698 = vmatmul.mubr.msk.f32.vlgmr.msra.gmra.mxu1 %vm995_vm2, %v3540_v38 }
 0x4f9   : > { %1903 = vmatprep.mubr.f32.mxu1 %v4370_v8 }
 0x4fc   : > { %2699 = vmatmul.mubr.msk.f32.gmra.mxu1 %vm995_vm2, %v3548_v30 }
 0x4fd   : > { %1909 = vmatprep.mubr.f32.mxu1 %v4370_v8 }
 0x500   : > { %2700 = vmatmul.mubr.msk.f32.gmra.mxu1 %vm995_vm2, %v3556_v61 }
 0x501   : > { %1915 = vmatprep.mubr.f32.mxu1 %v4370_v8 }
 0x504   : > { %2701 = vmatmul.mubr.msk.f32.gmra.mxu1 %vm995_vm2, %v3564_v52 }
 0x505   : > { %1921 = vmatprep.mubr.f32.mxu1 %v4370_v8 }
 0x508   : > { %2702 = vmatmul.mubr.msk.f32.gmra.mxu1 %vm995_vm2, %v3572_v13 }
 0x509   : > { %1927 = vmatprep.mubr.f32.mxu1 %v4370_v8 }
 0x50c   : > { %2703 = vmatmul.mubr.msk.f32.gmra.mxu1 %vm995_vm2, %v3580_v7 }
 0x50d   : > { %1933 = vmatprep.mubr.f32.mxu1 %v4370_v8 }
 0x510   : > { %2704 = vmatmul.mubr.msk.f32.gmra.mxu1 %vm995_vm2, %v3587_v53 }
 0x511   : > { %1939 = vmatprep.mubr.f32.mxu1 %v4370_v8 }
 0x514   : > { %2705 = vmatmul.mubr.msk.f32.gmra.mxu1 %vm995_vm2, %v3598_v55 }
 0x515   : > { %1945 = vmatprep.mubr.f32.mxu1 %v4370_v8 }
 0x518   : > { %2706 = vmatmul.mubr.msk.f32.gmra.mxu1 %vm995_vm2, %v3604_v39 }
 0x519   : > { %1951 = vmatprep.mubr.f32.mxu1 %v4370_v8 }
 0x51c   : > { %2707 = vmatmul.mubr.msk.f32.gmra.mxu1 %vm995_vm2, %v3612_v57 }
 0x51d   : > { %1957 = vmatprep.mubr.f32.mxu1 %v4370_v8 }
 0x520   : > { %2708 = vmatmul.mubr.msk.f32.gmra.mxu1 %vm995_vm2, %v3620_v46 }
 0x521   : > { %1963 = vmatprep.mubr.f32.mxu1 %v4370_v8 }
 0x524   : > { %2709 = vmatmul.mubr.msk.f32.gmra.mxu1 %vm995_vm2, %v3628_v19 }
 0x525   : > { %1969 = vmatprep.mubr.f32.mxu1 %v4370_v8 }
 0x528   : > { %2710 = vmatmul.mubr.msk.f32.gmra.mxu1 %vm995_vm2, %v4371_v9 }
 0x529   : > { %1975 = vmatprep.mubr.f32.mxu1 %v4370_v8 }
 0x52c   : > { %2711 = vmatmul.mubr.msk.f32.gmra.mxu1 %vm995_vm2, %v4372_v17 }
 0x52d   : > { %1981 = vmatprep.mubr.f32.mxu1 %v4370_v8 }
 0x530   : > { %2712 = vmatmul.mubr.msk.f32.gmra.mxu1 %vm995_vm2, %v4373_v25 }
 0x531   : > { %1987 = vmatprep.mubr.f32.mxu1 %v4370_v8 }
 0x534   : > { %2713 = vmatmul.mubr.msk.f32.gmra.mxu1 %vm995_vm2, %v4374_v37 }
 0x5b4   : > { %v4006_v36 = vpop.f32.mrf.mxu1 }
 0x5b6   : > { %v1813_v38 = vpop.f32.mrf.mxu1 }
 0x5b8   : > { %v4008_v30 = vpop.f32.mrf.mxu1 }
 0x5ba   : > { %v4010_v61 = vpop.f32.mrf.mxu1 }
 0x5bc   : > { %v4012_v52 = vpop.f32.mrf.mxu1 }
 0x5be   : > { %v4014_v13 = vpop.f32.mrf.mxu1 }
 0x5c0   : > { %v4016_v7 = vpop.f32.mrf.mxu1 }
 0x5c2   : > { %v4018_v53 = vpop.f32.mrf.mxu1 }
 0x5c4   : > { %v4020_v55 = vpop.f32.mrf.mxu1 }
 0x5c6   : > { %v4022_v39 = vpop.f32.mrf.mxu1 }
 0x5c8   : > { %v4024_v57 = vpop.f32.mrf.mxu1 }
 0x5ca   : > { %v4026_v46 = vpop.f32.mrf.mxu1 }
 0x5cc   : > { %v1929_v19 = vpop.f32.mrf.mxu1 }
 0x5cd   : > { %v4086_v38 = vmul.f32 0.35355338, %v1929_v19  ;;  %v4104_v19 = vmul.f32 0.35355338, %v4024_v57  ;;  %v4120_v57 = vmul.f32 0.35355338, %v4016_v7 }
 0x5ce   : > { %v1931_v15 = vpop.f32.mrf.mxu1 }
 0x5cf   : > { %v4078_v9 = vmul.f32 0.35355338, %v1931_v15  ;;  %v4094_v15 = vmul.f32 0.35355338, %v4026_v46  ;;  %v4110_v46 = vmul.f32 0.35355338, %v4018_v53 }
 0x5d0   : > { %v1935_v56 = vpop.f32.mrf.mxu1 }
 0x5d2   : > { %v1937_v51 = vpop.f32.mrf.mxu1 }
 0x5d3   : > { %v4080_v17 = vmul.f32 0.35355338, %v1937_v51  ;;  %v2041_v51 = vmax.f32 %v4086_v38, %v4078_v9 }
 0x5d4   : > { %v1941_v1 = vpop.f32.mrf.mxu1 }
 0x5d5   : > { %v4074_v11 = vmul.f32 0.35355338, %v1941_v1  ;;  %v4091_v1 = vmul.f32 0.35355338, %v4022_v39  ;;  %v4107_v39 = vmul.f32 0.35355338, %v4014_v13 }
 0x5d6   : > { %v1943_v21 = vpop.f32.mrf.mxu1  ;;  %v4123_v13 = vmul.f32 0.35355338, %v4010_v61 }
 0x5d7   : > { %v4066_v16 = vmul.f32 0.35355338, %v1943_v21  ;;  %v4088_v21 = vmul.f32 0.35355338, %v1935_v56 }
 0x5d8   : > { %v1947_v18 = vpop.f32.mrf.mxu1 }
 0x5d9   : > { %v4076_v62 = vmul.f32 0.35355338, %v1947_v18  ;;  %v2047_v25 = vmax.f32 %v4074_v11, %v4066_v16  ;;  %v2044_v18 = vmax.f32 %v4088_v21, %v4080_v17 }
 0x5da   : > { %v1949_v24 = vpop.f32.mrf.mxu1 }
 0x5db   : > { %v4068_v60 = vmul.f32 0.35355338, %v1949_v24  ;;  %v4101_v24 = vmul.f32 0.35355338, %v4020_v55  ;;  %v4117_v55 = vmul.f32 0.35355338, %v4012_v52 }
 0x5dc   : > { %v1953_v26 = vpop.f32.mrf.mxu1 }
 0x5dd   : > { %v4062_v47 = vmul.f32 0.35355338, %v1953_v26  ;;  %v2050_v37 = vmax.f32 %v4076_v62, %v4068_v60  ;;  %v2035_v56 = vmax.f32 %v4101_v24, %v4091_v1  ;;  %v2038_v26 = vmax.f32 %v4104_v19, %v4094_v15 }
 0x5de   : > { %v1955_v41 = vpop.f32.mrf.mxu1  ;;  %v2029_v53 = vmax.f32 %v4117_v55, %v4107_v39 }
 0x5df   : > { %v4054_v14 = vmul.f32 0.35355338, %v1955_v41  ;;  %v2032_v41 = vmax.f32 %v4120_v57, %v4110_v46 }
 0x5e0   : > { %v1959_v59 = vpop.f32.mrf.mxu1 }
 0x5e1   : > { %v4064_v54 = vmul.f32 0.35355338, %v1959_v59  ;;  %v2053_v43 = vmax.f32 %v4062_v47, %v4054_v14  ;;  %v4130_v59 = vmul.f32 0.35355338, %v4008_v30 }
 0x5e2   : > { %v1961_v4 = vpop.f32.mrf.mxu1 }
 0x5e3   : > { %v4056_v0 = vmul.f32 0.35355338, %v1961_v4  ;;  %v2026_v52 = vmax.f32 %v4130_v59, %v4123_v13 }
 0x5e4   : > { %v1965_v12 = vpop.f32.mrf.mxu1 }
 0x5e5   : > { %v4050_v22 = vmul.f32 0.35355338, %v1965_v12  ;;  %v2056_v33 = vmax.f32 %v4064_v54, %v4056_v0 }
 0x5e6   : > { %v1967_v40 = vpop.f32.mrf.mxu1 }
 0x5e7   : > { %v4042_v34 = vmul.f32 0.35355338, %v1967_v40 }
 0x5e8   : > { %v1971_v63 = vpop.f32.mrf.mxu1 }
 0x5e9   : > { %v4052_v50 = vmul.f32 0.35355338, %v1971_v63  ;;  %v2059_v48 = vmax.f32 %v4050_v22, %v4042_v34 }
 0x5ea   : > { %v1973_v20 = vpop.f32.mrf.mxu1 }
 0x5eb   : > { %v4044_v32 = vmul.f32 0.35355338, %v1973_v20 }
 0x5ec   : > { %v1977_v44 = vpop.f32.mrf.mxu1 }
 0x5ed   : > { %v4036_v5 = vmul.f32 0.35355338, %v1977_v44  ;;  %v2062_v28 = vmax.f32 %v4052_v50, %v4044_v32 }
 0x5ee   : > { %v1979_v2 = vpop.f32.mrf.mxu1 }
 0x5ef   : > { %v4032_v31 = vmul.f32 0.35355338, %v1979_v2 }
 0x5f0   : > { %v1983_v23 = vpop.f32.mrf.mxu1 }
 0x5f1   : > { %v4028_v29 = vmul.f32 0.35355338, %v1983_v23  ;;  %v2065_v10 = vmax.f32 %v4036_v5, %v4032_v31 }
 0x5f2   : > { %v1985_v27 = vpop.f32.mrf.mxu1 }
 0x5f3   : > { %v4030_v6 = vmul.f32 0.35355338, %v1985_v27 }
 0x5f4   : > { %v1989_v45 = vpop.f32.mrf.mxu1 }
 0x5f5   : > { %v2068_v35 = vmax.f32 %v4028_v29, %v4030_v6  ;;  %v4038_v3 = vmul.f32 0.35355338, %v1989_v45 }
 0x5f6   : > { %v1991_v58 = vpop.f32.mrf.mxu1 }
 0x5f7   : > { %v4040_v49 = vmul.f32 0.35355338, %v1991_v58  ;;  %2069 = vmax.xlane.f32.xlu0 %v2068_v35 }
 0x5f9   : > { %v2071_v42 = vmax.f32 %v4038_v3, %v4040_v49 }
 0x5fb   : > { %2066 = vmax.xlane.f32.xlu0 %v2065_v10  ;;  %2072 = vmax.xlane.f32.xlu1 %v2071_v42 }
 0x5ff   : > { %2060 = vmax.xlane.f32.xlu0 %v2059_v48  ;;  %2063 = vmax.xlane.f32.xlu1 %v2062_v28 }
 0x603   : > { %2054 = vmax.xlane.f32.xlu0 %v2053_v43  ;;  %2057 = vmax.xlane.f32.xlu1 %v2056_v33 }
 0x607   : > { %2048 = vmax.xlane.f32.xlu0 %v2047_v25  ;;  %2051 = vmax.xlane.f32.xlu1 %v2050_v37 }
 0x60b   : > { %2042 = vmax.xlane.f32.xlu0 %v2041_v51  ;;  %2045 = vmax.xlane.f32.xlu1 %v2044_v18 }
 0x60f   : > { %2036 = vmax.xlane.f32.xlu0 %v2035_v56  ;;  %2039 = vmax.xlane.f32.xlu1 %v2038_v26 }
 0x613   : > { %2030 = vmax.xlane.f32.xlu0 %v2029_v53  ;;  %2033 = vmax.xlane.f32.xlu1 %v2032_v41 }
 0x617   : > { %2027 = vmax.xlane.f32.xlu1 %v2026_v52 }
 0x680   : > { %v2070_v7 = vpop.xlane.xlu0 %2069 }
 0x681   : > { %v2102_v4 = vsub.f32 %v4028_v29, %v2070_v7  ;;  %v2103_v61 = vsub.f32 %v4030_v6, %v2070_v7 }
 0x683   : > { %v2162_v12 = vmul.f32 1.442695, %v2102_v4  ;;  %v2164_v40 = vmul.f32 1.442695, %v2103_v61 }
 0x684   : > { %v2067_v63 = vpop.xlane.xlu0 %2066  ;;  %v2073_v20 = vpop.xlane.xlu1 %2072 }
 0x685   : > { %2958 = vpow2.f32 %v2162_v12  ;;  %v2100_v44 = vsub.f32 %v4036_v5, %v2067_v63  ;;  %v2101_v30 = vsub.f32 %v4032_v31, %v2067_v63  ;;  %v2104_v2 = vsub.f32 %v4038_v3, %v2073_v20 }
 0x686   : > { %2960 = vpow2.f32 %v2164_v40  ;;  %v2105_v23 = vsub.f32 %v4040_v49, %v2073_v20 }
 0x687   : > { %v2158_v27 = vmul.f32 1.442695, %v2100_v44  ;;  %v2160_v45 = vmul.f32 1.442695, %v2101_v30  ;;  %v2166_v35 = vmul.f32 1.442695, %v2104_v2 }
 0x688   : > { %v2168_v29 = vmul.f32 1.442695, %v2105_v23  ;;  %v2061_v58 = vpop.xlane.xlu0 %2060  ;;  %v2064_v6 = vpop.xlane.xlu1 %2063 }
 0x689   : > { %2962 = vpow2.f32 %v2158_v27  ;;  %v2096_v10 = vsub.f32 %v4050_v22, %v2061_v58  ;;  %v2097_v42 = vsub.f32 %v4042_v34, %v2061_v58  ;;  %v2098_v5 = vsub.f32 %v4052_v50, %v2064_v6 }
 0x68a   : > { %2964 = vpow2.f32 %v2160_v45  ;;  %v2099_v31 = vsub.f32 %v4044_v32, %v2064_v6 }
 0x68b   : > { %2966 = vpow2.f32 %v2166_v35  ;;  %v2150_v3 = vmul.f32 1.442695, %v2096_v10  ;;  %v2152_v48 = vmul.f32 1.442695, %v2097_v42  ;;  %v2154_v49 = vmul.f32 1.442695, %v2098_v5 }
 0x68c   : > { %2968 = vpow2.f32 %v2168_v29  ;;  %v2156_v28 = vmul.f32 1.442695, %v2099_v31  ;;  %v2055_v43 = vpop.xlane.xlu0 %2054  ;;  %v2058_v33 = vpop.xlane.xlu1 %2057 }
 0x68d   : > { %2970 = vpow2.f32 %v2150_v3  ;;  %v2092_v25 = vsub.f32 %v4062_v47, %v2055_v43  ;;  %v2093_v22 = vsub.f32 %v4054_v14, %v2055_v43  ;;  %v2094_v34 = vsub.f32 %v4064_v54, %v2058_v33 }
 0x68e   : > { %2972 = vpow2.f32 %v2152_v48  ;;  %v2095_v50 = vsub.f32 %v4056_v0, %v2058_v33 }
 0x68f   : > { %2974 = vpow2.f32 %v2154_v49  ;;  %v2142_v32 = vmul.f32 1.442695, %v2092_v25  ;;  %v2144_v37 = vmul.f32 1.442695, %v2093_v22  ;;  %v2146_v51 = vmul.f32 1.442695, %v2094_v34 }
 0x690   : > { %2976 = vpow2.f32 %v2156_v28  ;;  %v2148_v18 = vmul.f32 1.442695, %v2095_v50  ;;  %v2049_v56 = vpop.xlane.xlu0 %2048  ;;  %v2052_v26 = vpop.xlane.xlu1 %2051 }
 0x691   : > { %2978 = vpow2.f32 %v2142_v32  ;;  %v2088_v53 = vsub.f32 %v4074_v11, %v2049_v56  ;;  %v2089_v47 = vsub.f32 %v4066_v16, %v2049_v56  ;;  %v2090_v14 = vsub.f32 %v4076_v62, %v2052_v26 }
 0x692   : > { %v4151_v41 = vpop.eup %2958  ;;  %2980 = vpow2.f32 %v2144_v37  ;;  %v2091_v0 = vsub.f32 %v4068_v60, %v2052_v26 }
 0x693   : > { %v4154_v54 = vpop.eup %2960  ;;  %2982 = vpow2.f32 %v2146_v51  ;;  %v2134_v52 = vmul.f32 1.442695, %v2088_v53  ;;  %v2136_v7 = vmul.f32 1.442695, %v2089_v47  ;;  %v2138_v4 = vmul.f32 1.442695, %v2090_v14 }
 0x694   : > { %2984 = vpow2.f32 %v2148_v18  ;;  %v2140_v61 = vmul.f32 1.442695, %v2091_v0  ;;  %v2043_v12 = vpop.xlane.xlu0 %2042  ;;  %v2046_v40 = vpop.xlane.xlu1 %2045  ;;  %v2212_v16 = vadd.f32 %v4154_v54, %v4151_v41 }
 0x695   : > { %2986 = vpow2.f32 %v2134_v52  ;;  %v2084_v11 = vsub.f32 %v4086_v38, %v2043_v12  ;;  %v2085_v62 = vsub.f32 %v4078_v9, %v2043_v12  ;;  %v2086_v60 = vsub.f32 %v4088_v21, %v2046_v40 }
 0x696   : > { %v4161_v63 = vpop.eup %2962  ;;  %2988 = vpow2.f32 %v2136_v7  ;;  %v2087_v20 = vsub.f32 %v4080_v17, %v2046_v40  ;;  %2213 = vadd.xlane.f32.xlu1 %v2212_v16 }
 0x697   : > { %v4164_v44 = vpop.eup %2964  ;;  %2990 = vpow2.f32 %v2138_v4  ;;  %v2126_v30 = vmul.f32 1.442695, %v2084_v11  ;;  %v2128_v2 = vmul.f32 1.442695, %v2085_v62  ;;  %v2130_v23 = vmul.f32 1.442695, %v2086_v60 }
 0x698   : > { %v4166_v27 = vpop.eup %2966  ;;  %2992 = vpow2.f32 %v2140_v61  ;;  %v2132_v38 = vmul.f32 1.442695, %v2087_v20  ;;  %v2037_v45 = vpop.xlane.xlu0 %2036  ;;  %v2209_v22 = vadd.f32 %v4164_v44, %v4161_v63 }
 0x699   : > { %v2040_v9 = vpop.xlane.xlu1 %2039  ;;  %v4168_v35 = vpop.eup %2968  ;;  %2994 = vpow2.f32 %v2126_v30  ;;  %v2080_v21 = vsub.f32 %v4101_v24, %v2037_v45  ;;  %v2081_v17 = vsub.f32 %v4091_v1, %v2037_v45 }
 0x69a   : > { %v2082_v29 = vsub.f32 %v4104_v19, %v2040_v9  ;;  %v4173_v58 = vpop.eup %2970  ;;  %2996 = vpow2.f32 %v2128_v2  ;;  %v2083_v6 = vsub.f32 %v4094_v15, %v2040_v9  ;;  %v2215_v10 = vadd.f32 %v4168_v35, %v4166_v27 }
 0x69b   : > { %v4178_v42 = vpop.eup %2972  ;;  %2998 = vpow2.f32 %v2130_v23  ;;  %v2118_v5 = vmul.f32 1.442695, %v2080_v21  ;;  %v2120_v31 = vmul.f32 1.442695, %v2081_v17 }
 0x69c   : > { %v2122_v3 = vmul.f32 1.442695, %v2082_v29  ;;  %v4180_v48 = vpop.eup %2974  ;;  %3000 = vpow2.f32 %v2132_v38  ;;  %v2124_v1 = vmul.f32 1.442695, %v2083_v6  ;;  %2216 = vadd.xlane.f32.xlu0 %v2215_v10  ;;  %v2031_v24 = vpop.xlane.xlu0 %2030  ;;  %v2203_v53 = vadd.f32 %v4178_v42, %v4173_v58 }
 0x69d   : > { %v2034_v19 = vpop.xlane.xlu1 %2033  ;;  %v4182_v49 = vpop.eup %2976  ;;  %3002 = vpow2.f32 %v2118_v5  ;;  %v2076_v15 = vsub.f32 %v4117_v55, %v2031_v24  ;;  %v2077_v28 = vsub.f32 %v4107_v39, %v2031_v24  ;;  %v2487_v24 = vld [vmem:[%s4356_s11] sm:$0x3f] }
 0x69e   : > { %v2078_v43 = vsub.f32 %v4120_v57, %v2034_v19  ;;  %v4187_v33 = vpop.eup %2978  ;;  %3004 = vpow2.f32 %v2120_v31  ;;  %v2079_v25 = vsub.f32 %v4110_v46, %v2034_v19  ;;  %v2206_v34 = vadd.f32 %v4182_v49, %v4180_v48 }
 0x69f   : > { %v4194_v50 = vpop.eup %2980  ;;  %3006 = vpow2.f32 %v2122_v3  ;;  %v2110_v32 = vmul.f32 1.442695, %v2076_v15  ;;  %v2112_v55 = vmul.f32 1.442695, %v2077_v28 }
 0x6a0   : > { %v2114_v37 = vmul.f32 1.442695, %v2078_v43  ;;  %v4196_v39 = vpop.eup %2982  ;;  %3008 = vpow2.f32 %v2124_v1  ;;  %v2116_v57 = vmul.f32 1.442695, %v2079_v25  ;;  %2210 = vadd.xlane.f32.xlu0 %v2209_v22  ;;  %2207 = vadd.xlane.f32.xlu1 %v2206_v34  ;;  %v2197_v4 = vadd.f32 %v4194_v50, %v4187_v33  ;;  %v2488_v1 = vld [vmem:[%s4357_s12] sm:$0x3f] }
 0x6a1   : > { %v2028_v51 = vpop.xlane.xlu1 %2027  ;;  %v4198_v46 = vpop.eup %2984  ;;  %3010 = vpow2.f32 %v2110_v32 }
 0x6a2   : > { %v2074_v18 = vsub.f32 %v4130_v59, %v2028_v51  ;;  %v2075_v56 = vsub.f32 %v4123_v13, %v2028_v51  ;;  %v4202_v26 = vpop.eup %2986  ;;  %3012 = vpow2.f32 %v2112_v55  ;;  %v2200_v47 = vadd.f32 %v4198_v46, %v4196_v39 }
 0x6a3   : > { %v4208_v14 = vpop.eup %2988  ;;  %3014 = vpow2.f32 %v2114_v37 }
 0x6a4   : > { %v2106_v0 = vmul.f32 1.442695, %v2074_v18  ;;  %v2108_v52 = vmul.f32 1.442695, %v2075_v56  ;;  %v4210_v7 = vpop.eup %2990  ;;  %3016 = vpow2.f32 %v2116_v57  ;;  %2204 = vadd.xlane.f32.xlu0 %v2203_v53  ;;  %2201 = vadd.xlane.f32.xlu1 %v2200_v47  ;;  %v2191_v62 = vadd.f32 %v4208_v14, %v4202_v26 }
 0x6a5   : > { %v4212_v13 = vpop.eup %2992 }
 0x6a6   : > { %3018 = vpow2.f32 %v2106_v0  ;;  %v4214_v59 = vpop.eup %2994  ;;  %v2194_v61 = vadd.f32 %v4212_v13, %v4210_v7 }
 0x6a7   : > { %3020 = vpow2.f32 %v2108_v52  ;;  %v4220_v12 = vpop.eup %2996 }
 0x6a8   : > { %v4222_v40 = vpop.eup %2998  ;;  %2198 = vadd.xlane.f32.xlu0 %v2197_v4  ;;  %2195 = vadd.xlane.f32.xlu1 %v2194_v61  ;;  %v2185_v38 = vadd.f32 %v4220_v12, %v4214_v59 }
 0x6a9   : > { %v4224_v16 = vpop.eup %3000 }
 0x6aa   : > { %v4226_v11 = vpop.eup %3002  ;;  %v2188_v60 = vadd.f32 %v4224_v16, %v4222_v40 }
 0x6ab   : > { %v4232_v20 = vpop.eup %3004 }
 0x6ac   : > { %v4234_v30 = vpop.eup %3006  ;;  %2192 = vadd.xlane.f32.xlu0 %v2191_v62  ;;  %2189 = vadd.xlane.f32.xlu1 %v2188_v60  ;;  %v2179_v6 = vadd.f32 %v4232_v20, %v4226_v11 }
 0x6ad   : > { %v4236_v2 = vpop.eup %3008 }
 0x6ae   : > { %v4238_v23 = vpop.eup %3010  ;;  %v2182_v45 = vadd.f32 %v4236_v2, %v4234_v30 }
 0x6af   : > { %v4244_v9 = vpop.eup %3012 }
 0x6b0   : > { %v4246_v21 = vpop.eup %3014  ;;  %2186 = vadd.xlane.f32.xlu0 %v2185_v38  ;;  %2183 = vadd.xlane.f32.xlu1 %v2182_v45  ;;  %v2173_v3 = vadd.f32 %v4244_v9, %v4238_v23 }
 0x6b1   : > { %v4248_v17 = vpop.eup %3016 }
 0x6b2   : > { %v2176_v10 = vadd.f32 %v4248_v17, %v4246_v21 }
 0x6b3   : > { %v4250_v29 = vpop.eup %3018 }
 0x6b4   : > { %v4256_v5 = vpop.eup %3020  ;;  %2180 = vadd.xlane.f32.xlu0 %v2179_v6  ;;  %2177 = vadd.xlane.f32.xlu1 %v2176_v10 }
 0x6b5   : > { %v2170_v31 = vadd.f32 %v4256_v5, %v4250_v29 }
 0x6b8   : > { %2174 = vadd.xlane.f32.xlu0 %v2173_v3  ;;  %2171 = vadd.xlane.f32.xlu1 %v2170_v31 }
 0x6c9   : > { %2519 = vperm.xlu1 %2821, %v2488_v1  }
 0x6ce   : > { %2513 = vperm.xlu0 %2820, %v2487_v24  }
 0x71f   : > { %v2214_v19 = vpop.xlane.xlu1 %2213 }
 0x720   : > { %3022 = vrcp.f32 %v2214_v19 }
 0x725   : > { %v2217_v15 = vpop.xlane.xlu0 %2216 }
 0x726   : > { %3024 = vrcp.f32 %v2217_v15 }
 0x729   : > { %v2211_v28 = vpop.xlane.xlu0 %2210  ;;  %v2208_v43 = vpop.xlane.xlu1 %2207 }
 0x72a   : > { %3026 = vrcp.f32 %v2211_v28 }
 0x72b   : > { %3028 = vrcp.f32 %v2208_v43 }
 0x72d   : > { %v2205_v25 = vpop.xlane.xlu0 %2204  ;;  %v3023_v22 = vpop.eup %3022 }
 0x72e   : > { %3030 = vrcp.f32 %v2205_v25  ;;  %v2202_v32 = vpop.xlane.xlu1 %2201  ;;  %v2263_v57 = vmul.f32 %v3023_v22, %v4154_v54  ;;  %v2262_v56 = vmul.f32 %v3023_v22, %v4151_v41 }
 0x72f   : > { %3032 = vrcp.f32 %v2202_v32 }
 0x731   : > { %v2199_v18 = vpop.xlane.xlu0 %2198 }
 0x732   : > { %3034 = vrcp.f32 %v2199_v18  ;;  %v2196_v0 = vpop.xlane.xlu1 %2195 }
 0x733   : > { %v3025_v34 = vpop.eup %3024  ;;  %3036 = vrcp.f32 %v2196_v0 }
 0x734   : > { %v2265_v55 = vmul.f32 %v3025_v34, %v4168_v35  ;;  %v2264_v37 = vmul.f32 %v3025_v34, %v4166_v27 }
 0x735   : > { %v2193_v54 = vpop.xlane.xlu0 %2192 }
 0x736   : > { %2266 = vmatprep.subr.mxu0 %v2265_v55  ;;  %3038 = vrcp.f32 %v2193_v54  ;;  %v2485_v55 = vld [vmem:[%s519_s20] sm:$0x3f] }
 0x737   : > { %v3027_v51 = vpop.eup %3026  ;;  %2267 = vmatpush1.xpose.msra.mxu0 %v2264_v37 }
 0x738   : > { %2268 = vmatprep.subr.mxu0 %v2263_v57  ;;  %v2261_v53 = vmul.f32 %v3027_v51, %v4164_v44  ;;  %v3029_v47 = vpop.eup %3028  ;;  %v2260_v35 = vmul.f32 %v3027_v51, %v4161_v63  ;;  %v2190_v44 = vpop.xlane.xlu1 %2189 }
 0x739   : > { %v2259_v27 = vmul.f32 %v3029_v47, %v4182_v49  ;;  %v2258_v4 = vmul.f32 %v3029_v47, %v4180_v48  ;;  %3040 = vrcp.f32 %v2190_v44  ;;  %v2187_v49 = vpop.xlane.xlu0 %2186 }
 0x73a   : > { %3042 = vrcp.f32 %v2187_v49 }
 0x73b   : > { %2269 = vmatpush1.xpose.msra.mxu0 %v2262_v56  ;;  %v3031_v52 = vpop.eup %3030 }
 0x73c   : > { %2270 = vmatprep.subr.mxu0 %v2261_v53  ;;  %v2257_v41 = vmul.f32 %v3031_v52, %v4178_v42  ;;  %v3033_v61 = vpop.eup %3032  ;;  %v2256_v62 = vmul.f32 %v3031_v52, %v4173_v58  ;;  %v2184_v42 = vpop.xlane.xlu1 %2183 }
 0x73d   : > { %v2255_v63 = vmul.f32 %v3033_v61, %v4198_v46  ;;  %v2254_v38 = vmul.f32 %v3033_v61, %v4196_v39  ;;  %3044 = vrcp.f32 %v2184_v42  ;;  %v2181_v46 = vpop.xlane.xlu0 %2180 }
 0x73e   : > { %3046 = vrcp.f32 %v2181_v46 }
 0x73f   : > { %2271 = vmatpush1.xpose.msra.mxu0 %v2260_v35  ;;  %v3035_v60 = vpop.eup %3034 }
 0x740   : > { %2272 = vmatprep.subr.mxu0 %v2259_v27  ;;  %v2253_v48 = vmul.f32 %v3035_v60, %v4194_v50  ;;  %v3037_v45 = vpop.eup %3036  ;;  %v2252_v6 = vmul.f32 %v3035_v60, %v4187_v33  ;;  %v2178_v50 = vpop.xlane.xlu1 %2177 }
 0x741   : > { %v2251_v58 = vmul.f32 %v3037_v45, %v4212_v13  ;;  %v2250_v31 = vmul.f32 %v3037_v45, %v4210_v7  ;;  %3048 = vrcp.f32 %v2178_v50  ;;  %v2175_v13 = vpop.xlane.xlu0 %2174 }
 0x742   : > { %3050 = vrcp.f32 %v2175_v13 }
 0x743   : > { %2273 = vmatpush1.xpose.msra.mxu0 %v2258_v4  ;;  %v3039_v10 = vpop.eup %3038 }
 0x744   : > { %2274 = vmatprep.subr.mxu0 %v2257_v41  ;;  %v2249_v39 = vmul.f32 %v3039_v10, %v4208_v14  ;;  %v2248_v1 = vmul.f32 %v3039_v10, %v4202_v26  ;;  %v2172_v14 = vpop.xlane.xlu1 %2171 }
 0x745   : > { %3052 = vrcp.f32 %v2172_v14 }
 0x746   : > { %v3041_v3 = vpop.eup %3040 }
 0x747   : > { %2275 = vmatpush1.xpose.msra.mxu0 %v2256_v62  ;;  %v2247_v33 = vmul.f32 %v3041_v3, %v4224_v16  ;;  %v3043_v24 = vpop.eup %3042  ;;  %v2246_v19 = vmul.f32 %v3041_v3, %v4222_v40 }
 0x748   : > { %2276 = vmatprep.subr.mxu0 %v2255_v63  ;;  %v2245_v7 = vmul.f32 %v3043_v24, %v4220_v12  ;;  %v2244_v28 = vmul.f32 %v3043_v24, %v4214_v59  ;;  %v2520_v10 = vpop.permute.xlu1 %2519 }
 0x74a   : > { %v3045_v15 = vpop.eup %3044 }
 0x74b   : > { %2277 = vmatpush1.xpose.msra.mxu0 %v2254_v38  ;;  %v2243_v26 = vmul.f32 %v3045_v15, %v4236_v2  ;;  %v3047_v43 = vpop.eup %3046  ;;  %v2242_v16 = vmul.f32 %v3045_v15, %v4234_v30 }
 0x74c   : > { %2278 = vmatprep.subr.mxu0 %v2253_v48  ;;  %v2241_v25 = vmul.f32 %v3047_v43, %v4232_v20  ;;  %v2240_v12 = vmul.f32 %v3047_v43, %v4226_v11 }
 0x74e   : > { %v3049_v40 = vpop.eup %3048 }
 0x74f   : > { %2279 = vmatpush1.xpose.msra.mxu0 %v2252_v6  ;;  %v2239_v22 = vmul.f32 %v3049_v40, %v4248_v17  ;;  %v3051_v34 = vpop.eup %3050  ;;  %v2238_v59 = vmul.f32 %v3049_v40, %v4246_v21  ;;  %v4375_v17 = vld [vmem:[#allocation2_spill] sm:$0xff]  ;;  %v2514_v6 = vpop.permute.xlu0 %2513 }
 0x750   : > { %2280 = vmatprep.subr.mxu0 %v2251_v58  ;;  %v2237_v2 = vmul.f32 %v3051_v34, %v4244_v9  ;;  %v2236_v30 = vmul.f32 %v3051_v34, %v4238_v23  ;;  %v2714_v23 = vld [vmem:[%s4350_s5 + $0x8] sm:$0x3f] }
 0x752   : > { %v3053_v32 = vpop.eup %3052 }
 0x753   : > { %2281 = vmatpush1.xpose.msra.mxu0 %v2250_v31  ;;  %v2235_v20 = vmul.f32 %v3053_v32, %v4256_v5  ;;  %v2234_v11 = vmul.f32 %v3053_v32, %v4250_v29  ;;  %v1815_v29 = vld [vmem:[%s4350_s5] sm:$0x3f] }
 0x754   : > { %2282 = vmatprep.subr.mxu0 %v2249_v39 }
 0x757   : > { %2283 = vmatpush1.xpose.msra.mxu0 %v2248_v1 }
 0x758   : > { %2284 = vmatprep.subr.mxu0 %v2247_v33 }
 0x75b   : > { %2285 = vmatpush1.xpose.msra.mxu0 %v2246_v19 }
 0x75c   : > { %2286 = vmatprep.subr.mxu0 %v2245_v7 }
 0x75f   : > { %2287 = vmatpush1.xpose.msra.mxu0 %v2244_v28 }
 0x760   : > { %2288 = vmatprep.subr.mxu0 %v2243_v26 }
 0x763   : > { %2289 = vmatpush1.xpose.msra.mxu0 %v2242_v16 }
 0x764   : > { %2290 = vmatprep.subr.mxu0 %v2241_v25 }
 0x767   : > { %2291 = vmatpush1.xpose.msra.mxu0 %v2240_v12 }
 0x768   : > { %2292 = vmatprep.subr.mxu0 %v2239_v22 }
 0x76b   : > { %2293 = vmatpush1.xpose.msra.mxu0 %v2238_v59 }
 0x76c   : > { %2294 = vmatprep.subr.mxu0 %v2237_v2 }
 0x76f   : > { %2295 = vmatpush1.xpose.msra.mxu0 %v2236_v30 }
 0x770   : > { %2296 = vmatprep.subr.mxu0 %v2235_v20 }
 0x773   : > { %2297 = vmatpush1.xpose.msra.mxu0 %v2234_v11 }
 0x774   : > { %2767 = vmatprep.subr.mxu0 %v4370_v8 }
 0x776   : > { %2331 = vmatmul.mubr.f32.vlgmr.msra.gmra.mxu0 %v4375_v17 }
 0x777   : > { %2769 = vmatprep.mubr.msk.f32.mxu0 %vm3098_vm3, %v4370_v8 }
 0x836   : > { %v2332_v9 = vpop.f32.mrf.mxu0 }
 0x837   : > { %2768 = vmatpush3.msra.mxu0 %v2332_v9 }
 0x838   : > { %v2334_v21 = vpop.f32.mrf.mxu0  ;;  %2770 = vmatmul.mubr.msk.f32.vlgmr.msra.gmra.mxu0 %vm2338_vm4, %v2714_v23  ;;  %2772 = vmatprep.subr.mxu0 %v4370_v8 }
 0x839   : > { %2773 = vmatpush3.msra.mxu0 %v4006_v36  ;;  %2774 = vmatprep.mubr.msk.f32.mxu0 %vm3098_vm3, %v4370_v8 }
 0x83c   : > { %2775 = vmatmul.mubr.msk.f32.vlgmr.msra.gmra.mxu0 %vm2338_vm4, %v1815_v29 }
 0x8f8   : > { %v2408_v5 = vpop.f32.mrf.mxu0 }
 0x8fa   : > { %v2771_v8 = vpop.f32.mrf.mxu0 }
 0x8fc   : > { %v2481_v36 = vpop.f32.mrf.mxu0 }
 0x8fd   : > { %v2482_v37 = vadd.f32 %v2481_v36, %v2408_v5 }
 0x8fe   : > { %v2776_v57 = vpop.f32.mrf.mxu0 }
 0x8ff   : > { %v2486_v51 = vadd.f32 %v2485_v55, %v2482_v37 }
 0x901   : > { %v2489_v18 = vsel %vm547_vm0, %v2486_v51, 0.0 }
 0x902   : > { %v2490_v56 = vrot.slane %v2489_v18, 4 }
 0x904   : > { %v2491_v53 = vadd.f32 %v2490_v56, %v2489_v18 }
 0x906   : > { %v2492_v47 = vrot.slane %v2491_v53, 2 }
 0x908   : > { %v2493_v0 = vadd.f32 %v2492_v47, %v2491_v53 }
 0x90a   : > { %v2494_v35 = vrot.slane %v2493_v0, 1 }
 0x90c   : > { %v2495_v27 = vadd.f32 %v2494_v35, %v2493_v0 }
 0x90e   : > { %v2497_v52 = vmul.f32 0.16666667, %v2495_v27 }
 0x910   : > { %v2498_v54 = vsub.f32 %v2486_v51, %v2497_v52 }
 0x912   : > { %v2499_v4 = vmul.f32 %v2498_v54, %v2498_v54 }
 0x914   : > { %v2500_v41 = vsel %vm547_vm0, %v2499_v4, 0.0 }
 0x915   : > { %v2501_v61 = vrot.slane %v2500_v41, 4 }
 0x917   : > { %v2502_v44 = vadd.f32 %v2501_v61, %v2500_v41 }
 0x919   : > { %v2503_v62 = vrot.slane %v2502_v44, 2 }
 0x91b   : > { %v2504_v63 = vadd.f32 %v2503_v62, %v2502_v44 }
 0x91d   : > { %v2505_v60 = vrot.slane %v2504_v63, 1 }
 0x91f   : > { %v2506_v49 = vadd.f32 %v2505_v60, %v2504_v63 }
 0x921   : > { %v2507_v38 = vmul.f32 0.16666667, %v2506_v49 }
 0x923   : > { %v2508_v48 = vadd.f32 1e-06, %v2507_v38 }
 0x925   : > { %3054 = vrsqrt.f32 %v2508_v48 }
 0x932   : > { %v3055_v45 = vpop.eup %3054 }
 0x933   : > { %v2510_v42 = vmul.f32 %v3055_v45, %v2498_v54 }
 0x935   : > { %v2516_v58 = vmul.f32 %v2514_v6, %v2510_v42 }
 0x937   : > { %v2522_v46 = vadd.f32 %v2520_v10, %v2516_v58 }
 0x939   : > { %v2523_v31 = vmax.f32 %v2522_v46, 0.0 }
 0x93b   : > { %2524 = vst [vmem:[%s527_s21] sm:$0x3f] %v2523_v31 }
 0x93c PF: > { %s23_s29 = sadd.s32 1, %s3094_s29   ;;  %s4376_s25 = smov %s3086_s27 }
 0x93d   : > { %p20_p8 = scmp.ge.s32.totalorder %s23_s29, 6   ;;  %s4377_s26 = smov %s3090_s28 }
 0x93e   : > { %s4378_s27 = smov %s4381_s30  ;;  %s4379_s28 = smov %s4385_s14 }
 0x93f   :  { %22 = sbr.rel (!%p20_p8) target bundleno = 3 (0x3), region = 110 }

</bundles_post_ra>
